<compile_context>
chip_gen: v7x
topology: tpu7x:2x2x1
jax: 0.10.0
libtpu: 0.0.40
codegen_flags: <defaults>
</compile_context>

<pallas_src>
import functools

import jax
import jax.numpy as jnp
from jax import lax
from jax.experimental import pallas as pl
from jax.experimental.pallas import tpu as pltpu


def _round_up(n, m):
    return (n + m - 1) // m * m


def _cdiv(a, b):
    return (a + b - 1) // b


# --------------------------------------------------------------------------
# Pallas kernel: chunked LSTM recurrence + final Linear projection.
# --------------------------------------------------------------------------
def _encoder_kernel(len_ref, gx_ref, whh_ref, wfc_ref, bfc_ref, out_ref,
                    h_ref, c_ref, *, hidden_pad, tc, unroll):
    Hp = hidden_pad
    tchunk = pl.program_id(1)

    @pl.when(tchunk == 0)
    def _init():
        h_ref[...] = jnp.zeros_like(h_ref)
        c_ref[...] = jnp.zeros_like(c_ref)

    # packed-sequence mask, hoisted out of the per-step body: compare the
    # in-chunk step index i directly against rel_lens.
    rel_lens = len_ref[...] - tchunk * tc            # (Tb, 1) int32

    def step(i, carry):
        h, c = carry
        # gx already holds x_t @ Wih^T + (b_ih + b_hh), streamed as bf16.
        # Only h @ Whh^T stays on the serial path; bf16 operands hit the
        # native MXU rate on v5e/v6e/v7x, accumulation in f32.
        gates = (gx_ref[i].astype(jnp.float32)
                 + jnp.dot(h.astype(jnp.bfloat16), whh_ref[...],
                           preferred_element_type=jnp.float32))
        # PyTorch gate order [i, f, g, o]; each slice is a full 128-lane tile.
        # Gate / elementwise math stays f32 (v5e VPU/EUP have no bf16).
        i_g = jax.nn.sigmoid(gates[:, 0 * Hp:1 * Hp])
        f_g = jax.nn.sigmoid(gates[:, 1 * Hp:2 * Hp])
        g_g = jnp.tanh(gates[:, 2 * Hp:3 * Hp])
        o_g = jax.nn.sigmoid(gates[:, 3 * Hp:4 * Hp])

        c_new = f_g * c + i_g * g_g
        h_new = o_g * jnp.tanh(c_new)

        # Freeze state once t >= length[b] (pack_padded_sequence semantics).
        active = i < rel_lens                        # (Tb, 1) bool
        c = jnp.where(active, c_new, c)
        h = jnp.where(active, h_new, h)
        return h, c

    h, c = lax.fori_loop(0, tc, step, (h_ref[...], c_ref[...]), unroll=unroll)
    h_ref[...] = h
    c_ref[...] = c

    @pl.when(tchunk == pl.num_programs(1) - 1)
    def _finalize():
        out_ref[...] = (jnp.dot(h_ref[...], wfc_ref[...],
                                preferred_element_type=jnp.float32)
                        + bfc_ref[...])


# --------------------------------------------------------------------------
# Wrapper
# --------------------------------------------------------------------------
def encoder_forward(x, lengths, params, *, time_chunk=32, max_batch_block=128):
    """x: (B, T, D) float32, lengths: (B,) int32 -> (B, L) float32."""
    B, T, D = x.shape
    w_ih, w_hh, b_ih, b_hh, w_fc, b_fc = (params[k] for k in
                                          ("w_ih", "w_hh", "b_ih", "b_hh",
                                           "w_fc", "b_fc"))
    H = w_hh.shape[1]
    L = w_fc.shape[0]

    LANE, SUB = 128, 8
    # Lane-dense hidden / latent; align the K dim of the serial h@Whh matmul
    # to 256 when H is large enough to fill the v6e/v7x 256-wide MXU.
    Hp = _round_up(H, 256) if H >= 256 else _round_up(H, LANE)
    Lp = _round_up(L, LANE)

    # Batch block: large (shortens the (Bp/Tb)*T serial chain and fills MXU
    # rows), but keep >= 2 blocks when the batch allows so the "parallel"
    # batch grid axis actually splits across v7x's two TensorCores.
    Tb = min(_round_up(B, SUB), max_batch_block)
    if B >= 2 * SUB and _cdiv(B, Tb) < 2:
        Tb = _round_up(_cdiv(B, 2), SUB)
    Bp = _round_up(B, Tb)

    # Time chunk: amortize per-grid-step overhead; shrink until the bf16 gx
    # double buffer fits a conservative budget (safe under the 16 MiB v5e /
    # 32 MiB v6e / v7x default scoped VMEM limits even at large H).
    Tc = min(T, time_chunk)
    while Tc > 8 and 2 * Tc * Tb * 4 * Hp * 2 > (16 << 20):
        Tc = max(8, Tc // 2)
    Tp = _round_up(T, Tc)
    # TODO(synk): when T is not a multiple of Tc the tail chunk runs frozen
    # (masked) steps; pick time_chunk dividing T to avoid the wasted work.
    unroll = max(1, min(Tc, 8))   # partial unroll: scheduler overlap, no spill

    f32 = jnp.float32

    # ---- hoisted input projection (pad-first, transpose folded in) --------
    wih_p = jnp.pad(w_ih.astype(f32).reshape(4, H, D),
                    ((0, 0), (0, Hp - H), (0, 0))).reshape(4 * Hp, D)
    bias_p = jnp.pad((b_ih + b_hh).astype(f32).reshape(4, H),
                     ((0, 0), (0, Hp - H))).reshape(4 * Hp)
    x_p = jnp.pad(x.astype(f32), ((0, Bp - B), (0, Tp - T), (0, 0)))
    gx = jnp.einsum("btd,gd->tbg", x_p, wih_p,
                    preferred_element_type=f32) + bias_p
    gx = gx.astype(jnp.bfloat16)                       # (Tp, Bp, 4*Hp) bf16

    # ---- recurrent weight, padded, gate-blocked, bf16: (Hp, 4*Hp) ---------
    whh = w_hh.astype(f32).reshape(4, H, H).transpose(2, 0, 1)  # (in,gate,out)
    whh = jnp.pad(whh, ((0, Hp - H), (0, 0), (0, Hp - H)))
    whh = whh.reshape(Hp, 4 * Hp).astype(jnp.bfloat16)

    # ---- fc weights (final projection stays f32) ---------------------------
    wfc = jnp.pad(w_fc.T.astype(f32), ((0, Hp - H), (0, Lp - L)))
    bfc = jnp.pad(b_fc.astype(f32), (0, Lp - L)).reshape(1, Lp)

    # ---- lengths: padded batch rows get length 0 -> state stays frozen -----
    lenp = jnp.pad(lengths.astype(jnp.int32), (0, Bp - B)).reshape(Bp, 1)

    # Padded-lane invariant: padded hidden lanes stay exactly 0 because h/c
    # start at 0 and gx / Whh / bias / Wfc padding is 0 (sigmoid(0) gates
    # multiply tanh(0)=0).  Do not add non-zero initial state or bias into
    # padded lanes without re-deriving this.

    kernel = functools.partial(_encoder_kernel, hidden_pad=Hp, tc=Tc,
                               unroll=unroll)

    # VMEM budget: double-buffered bf16 gx + single-buffered weights + state.
    est = (2 * Tc * Tb * 4 * Hp * 2            # gx double buffer (bf16)
           + Hp * 4 * Hp * 2                   # Whh (bf16, single buffer)
           + Hp * Lp * 4 + Lp * 4              # Wfc + bias (f32)
           + 2 * Tb * Lp * 4                   # output double buffer
           + 2 * Tb * Hp * 4                   # h/c scratch
           + 2 * Tb * 4)                       # lengths
    vmem_limit = min(max(int(est * 3 // 2) + (1 << 20), 32 << 20), 64 << 20)

    const_buf = pl.Buffered(1)   # weight blocks never change -> no 2nd buffer

    out = pl.pallas_call(
        kernel,
        out_shape=jax.ShapeDtypeStruct((Bp, Lp), jnp.float32),
        grid=(Bp // Tb, Tp // Tc),
        in_specs=[
            pl.BlockSpec((Tb, 1), lambda b, t: (b, 0)),              # lengths
            pl.BlockSpec((Tc, Tb, 4 * Hp), lambda b, t: (t, b, 0)),  # gx chunk
            pl.BlockSpec((Hp, 4 * Hp), lambda b, t: (0, 0),
                         pipeline_mode=const_buf),                   # Whh^T
            pl.BlockSpec((Hp, Lp), lambda b, t: (0, 0),
                         pipeline_mode=const_buf),                   # Wfc^T
            pl.BlockSpec((1, Lp), lambda b, t: (0, 0),
                         pipeline_mode=const_buf),                   # fc bias
        ],
        out_specs=pl.BlockSpec((Tb, Lp), lambda b, t: (b, 0)),
        scratch_shapes=[
            pltpu.VMEM((Tb, Hp), jnp.float32),                       # h state
            pltpu.VMEM((Tb, Hp), jnp.float32),                       # c state
        ],
        compiler_params=pltpu.CompilerParams(
            dimension_semantics=("parallel", "arbitrary"),
            vmem_limit_bytes=vmem_limit),
    )(lenp, gx, whh, wfc, bfc)

    return out[:B, :L]


# --------------------------------------------------------------------------
# Pure-JAX f32 reference (mirrors torch packed LSTM + Linear)
# --------------------------------------------------------------------------
def encoder_reference(x, lengths, params):
    B, T, D = x.shape
    H = params["w_hh"].shape[1]
    h = jnp.zeros((B, H), jnp.float32)
    c = jnp.zeros((B, H), jnp.float32)
    bias = params["b_ih"] + params["b_hh"]
    for t in range(T):
        gates = x[:, t, :] @ params["w_ih"].T + h @ params["w_hh"].T + bias
        i_g = jax.nn.sigmoid(gates[:, 0 * H:1 * H])
        f_g = jax.nn.sigmoid(gates[:, 1 * H:2 * H])
        g_g = jnp.tanh(gates[:, 2 * H:3 * H])
        o_g = jax.nn.sigmoid(gates[:, 3 * H:4 * H])
        c_new = f_g * c + i_g * g_g
        h_new = o_g * jnp.tanh(c_new)
        mask = (t < lengths)[:, None]
        c = jnp.where(mask, c_new, c)
        h = jnp.where(mask, h_new, h)
    return h @ params["w_fc"].T + params["b_fc"]


# --------------------------------------------------------------------------
# Deterministic parameter init (matches nn.LSTM / nn.Linear shapes)
# --------------------------------------------------------------------------
def init_params(key, input_size, hidden_size, latent_size):
    ks = jax.random.split(key, 6)
    s = 1.0 / jnp.sqrt(hidden_size)
    return {
        "w_ih": jax.random.uniform(ks[0], (4 * hidden_size, input_size),
                                   jnp.float32, -s, s),
        "w_hh": jax.random.uniform(ks[1], (4 * hidden_size, hidden_size),
                                   jnp.float32, -s, s),
        "b_ih": jax.random.uniform(ks[2], (4 * hidden_size,),
                                   jnp.float32, -s, s),
        "b_hh": jax.random.uniform(ks[3], (4 * hidden_size,),
                                   jnp.float32, -s, s),
        "w_fc": jax.random.uniform(ks[4], (latent_size, hidden_size),
                                   jnp.float32, -s, s),
        "b_fc": jax.random.uniform(ks[5], (latent_size,),
                                   jnp.float32, -s, s),
    }


if __name__ == "__main__":
    B, T, D, H, L = 8, 8, 3, 32, 16

    key = jax.random.PRNGKey(0)
    k_x, k_len, k_p = jax.random.split(key, 3)

    x = jax.random.normal(k_x, (B, T, D), jnp.float32)
    lengths = jax.random.randint(k_len, (B,), 1, T + 1, jnp.int32)
    params = init_params(k_p, D, H, L)

    latent = encoder_forward(x, lengths, params)
    latent = jax.block_until_ready(latent)

    ref = encoder_reference(x, lengths, params)
    assert latent.shape == (B, L)
    # Relaxed tolerance: gx and the recurrent matmul operands are streamed in
    # bf16 (f32 accumulation), which accumulates small rounding error over T.
    assert jnp.allclose(latent, ref, atol=5e-2, rtol=5e-2), \
        f"max abs err {jnp.max(jnp.abs(latent - ref))}"

    print("KERNEL_OK")
</pallas_src>

<mosaic_0001>
module attributes {stable_mosaic.version = 11 : i64} {
  func.func @_encoder_kernel(%arg0: i32, %arg1: i32, %arg2: memref<8x1xi32, #tpu.memory_space<vmem>>, %arg3: memref<8x8x512xbf16, #tpu.memory_space<vmem>>, %arg4: memref<128x512xbf16, #tpu.memory_space<vmem>>, %arg5: memref<128x128xf32, #tpu.memory_space<vmem>>, %arg6: memref<1x128xf32, #tpu.memory_space<vmem>>, %arg7: memref<8x128xf32, #tpu.memory_space<vmem>>, %arg8: memref<8x128xf32, #tpu.memory_space<vmem>>, %arg9: memref<8x128xf32, #tpu.memory_space<vmem>>) attributes {dimension_semantics = [#tpu.dimension_semantics<parallel>, #tpu.dimension_semantics<arbitrary>], iteration_bounds = array<i64: 1, 1>, scalar_prefetch = 0 : i64, scratch_operands = 2 : i64, tpu.core_type = #tpu.core_type<tc>, window_params = [{transform_indices = @transform_0, window_bounds = array<i64: 8, 1>}, {transform_indices = @transform_1, window_bounds = array<i64: 8, 8, 512>}, {pipeline_mode = #tpu.pipeline_mode<synchronous>, transform_indices = @transform_2, window_bounds = array<i64: 128, 512>}, {pipeline_mode = #tpu.pipeline_mode<synchronous>, transform_indices = @transform_3, window_bounds = array<i64: 128, 128>}, {pipeline_mode = #tpu.pipeline_mode<synchronous>, transform_indices = @transform_4, window_bounds = array<i64: 1, 128>}, {transform_indices = @transform_5, window_bounds = array<i64: 8, 128>}]} {
    %c0_i32 = arith.constant 0 : i32
    %0 = arith.cmpi eq, %arg1, %c0_i32 : i32
    %1 = arith.extui %0 : i1 to i32
    %c0_i32_0 = arith.constant 0 : i32
    %2 = arith.cmpi ne, %1, %c0_i32_0 : i32
    scf.if %2 {
      %cst_77 = arith.constant 0.000000e+00 : f32
      %342 = vector.broadcast %cst_77 : f32 to vector<8x128xf32>
      %c0_78 = arith.constant 0 : index
      %c0_79 = arith.constant 0 : index
      %343 = vector.load %arg8[%c0_78, %c0_79] : memref<8x128xf32, #tpu.memory_space<vmem>>, vector<8x128xf32>
      tpu.vector_store %arg8[%c0_78, %c0_79], %342 {strides = array<i32>} : memref<8x128xf32, #tpu.memory_space<vmem>>, vector<8x128xf32>,
      %cst_80 = arith.constant 0.000000e+00 : f32
      %344 = vector.broadcast %cst_80 : f32 to vector<8x128xf32>
      %c0_81 = arith.constant 0 : index
      %c0_82 = arith.constant 0 : index
      %345 = vector.load %arg9[%c0_81, %c0_82] : memref<8x128xf32, #tpu.memory_space<vmem>>, vector<8x128xf32>
      tpu.vector_store %arg9[%c0_81, %c0_82], %344 {strides = array<i32>} : memref<8x128xf32, #tpu.memory_space<vmem>>, vector<8x128xf32>,
    } else {
    }
    %c0 = arith.constant 0 : index
    %c0_1 = arith.constant 0 : index
    %3 = vector.load %arg2[%c0, %c0_1] : memref<8x1xi32, #tpu.memory_space<vmem>>, vector<8x1xi32>
    %c8_i32 = arith.constant 8 : i32
    %4 = arith.muli %arg1, %c8_i32 : i32
    %5 = vector.broadcast %4 : i32 to vector<8x1xi32>
    %6 = arith.subi %3, %5 : vector<8x1xi32>
    %c0_2 = arith.constant 0 : index
    %c0_3 = arith.constant 0 : index
    %7 = vector.load %arg8[%c0_2, %c0_3] : memref<8x128xf32, #tpu.memory_space<vmem>>, vector<8x128xf32>
    %c0_4 = arith.constant 0 : index
    %c0_5 = arith.constant 0 : index
    %8 = vector.load %arg9[%c0_4, %c0_5] : memref<8x128xf32, #tpu.memory_space<vmem>>, vector<8x128xf32>
    %c0_i32_6 = arith.constant 0 : i32
    %9 = arith.index_cast %c0_i32_6 : i32 to index
    %c0_7 = arith.constant 0 : index
    %c0_8 = arith.constant 0 : index
    %10 = vector.load %arg3[%9, %c0_7, %c0_8] : memref<8x8x512xbf16, #tpu.memory_space<vmem>>, vector<1x8x512xbf16>
    %11 = vector.shape_cast %10 : vector<1x8x512xbf16> to vector<8x512xbf16>
    %12 = arith.extf %11 : vector<8x512xbf16> to vector<8x512xf32>
    %13 = arith.truncf %7 : vector<8x128xf32> to vector<8x128xbf16>
    %c0_9 = arith.constant 0 : index
    %c0_10 = arith.constant 0 : index
    %14 = vector.load %arg4[%c0_9, %c0_10] : memref<128x512xbf16, #tpu.memory_space<vmem>>, vector<128x512xbf16>
    %cst = arith.constant dense<0.000000e+00> : vector<8x512xf32>
    %15 = tpu.matmul %13, %14, %cst {dimension_numbers = #tpu.dot_dimension_numbers<[1], [0], [0], [1], [0, 0, 1, 1], [], []>} : vector<8x128xbf16>, vector<128x512xbf16>, vector<8x512xf32> -> vector<8x512xf32>
    %16 = arith.addf %12, %15 : vector<8x512xf32>
    %17 = vector.extract_strided_slice %16 {offsets = [0, 0], sizes = [8, 128], strides = [1, 1]} : vector<8x512xf32> to vector<8x128xf32>
    %18 = arith.negf %17 : vector<8x128xf32>
    %19 = math.exp %18 : vector<8x128xf32>
    %cst_11 = arith.constant 1.000000e+00 : f32
    %20 = vector.broadcast %cst_11 : f32 to vector<8x128xf32>
    %21 = arith.addf %20, %19 : vector<8x128xf32>
    %22 = arith.divf %20, %21 : vector<8x128xf32>
    %23 = vector.extract_strided_slice %16 {offsets = [0, 128], sizes = [8, 128], strides = [1, 1]} : vector<8x512xf32> to vector<8x128xf32>
    %24 = arith.negf %23 : vector<8x128xf32>
    %25 = math.exp %24 : vector<8x128xf32>
    %cst_12 = arith.constant 1.000000e+00 : f32
    %26 = vector.broadcast %cst_12 : f32 to vector<8x128xf32>
    %27 = arith.addf %26, %25 : vector<8x128xf32>
    %28 = arith.divf %26, %27 : vector<8x128xf32>
    %29 = vector.extract_strided_slice %16 {offsets = [0, 256], sizes = [8, 128], strides = [1, 1]} : vector<8x512xf32> to vector<8x128xf32>
    %30 = math.tanh %29 : vector<8x128xf32>
    %31 = vector.extract_strided_slice %16 {offsets = [0, 384], sizes = [8, 128], strides = [1, 1]} : vector<8x512xf32> to vector<8x128xf32>
    %32 = arith.negf %31 : vector<8x128xf32>
    %33 = math.exp %32 : vector<8x128xf32>
    %cst_13 = arith.constant 1.000000e+00 : f32
    %34 = vector.broadcast %cst_13 : f32 to vector<8x128xf32>
    %35 = arith.addf %34, %33 : vector<8x128xf32>
    %36 = arith.divf %34, %35 : vector<8x128xf32>
    %37 = arith.mulf %28, %8 : vector<8x128xf32>
    %38 = arith.mulf %22, %30 : vector<8x128xf32>
    %39 = arith.addf %37, %38 : vector<8x128xf32>
    %40 = math.tanh %39 : vector<8x128xf32>
    %41 = arith.mulf %36, %40 : vector<8x128xf32>
    %42 = vector.broadcast %c0_i32_6 : i32 to vector<8x1xi32>
    %43 = arith.cmpi slt, %42, %6 : vector<8x1xi32>
    %44 = vector.shape_cast %43 : vector<8x1xi1> to vector<8x1xi1>
    %45 = vector.broadcast %44 : vector<8x1xi1> to vector<8x128xi1>
    %46 = arith.select %45, %39, %8 : vector<8x128xi1>, vector<8x128xf32>
    %47 = vector.shape_cast %43 : vector<8x1xi1> to vector<8x1xi1>
    %48 = vector.broadcast %47 : vector<8x1xi1> to vector<8x128xi1>
    %49 = arith.select %48, %41, %7 : vector<8x128xi1>, vector<8x128xf32>
    %c1_i32 = arith.constant 1 : i32
    %50 = arith.index_cast %c1_i32 : i32 to index
    %c0_14 = arith.constant 0 : index
    %c0_15 = arith.constant 0 : index
    %51 = vector.load %arg3[%50, %c0_14, %c0_15] : memref<8x8x512xbf16, #tpu.memory_space<vmem>>, vector<1x8x512xbf16>
    %52 = vector.shape_cast %51 : vector<1x8x512xbf16> to vector<8x512xbf16>
    %53 = arith.extf %52 : vector<8x512xbf16> to vector<8x512xf32>
    %54 = arith.truncf %49 : vector<8x128xf32> to vector<8x128xbf16>
    %c0_16 = arith.constant 0 : index
    %c0_17 = arith.constant 0 : index
    %55 = vector.load %arg4[%c0_16, %c0_17] : memref<128x512xbf16, #tpu.memory_space<vmem>>, vector<128x512xbf16>
    %cst_18 = arith.constant dense<0.000000e+00> : vector<8x512xf32>
    %56 = tpu.matmul %54, %55, %cst_18 {dimension_numbers = #tpu.dot_dimension_numbers<[1], [0], [0], [1], [0, 0, 1, 1], [], []>} : vector<8x128xbf16>, vector<128x512xbf16>, vector<8x512xf32> -> vector<8x512xf32>
    %57 = arith.addf %53, %56 : vector<8x512xf32>
    %58 = vector.extract_strided_slice %57 {offsets = [0, 0], sizes = [8, 128], strides = [1, 1]} : vector<8x512xf32> to vector<8x128xf32>
    %59 = arith.negf %58 : vector<8x128xf32>
    %60 = math.exp %59 : vector<8x128xf32>
    %cst_19 = arith.constant 1.000000e+00 : f32
    %61 = vector.broadcast %cst_19 : f32 to vector<8x128xf32>
    %62 = arith.addf %61, %60 : vector<8x128xf32>
    %63 = arith.divf %61, %62 : vector<8x128xf32>
    %64 = vector.extract_strided_slice %57 {offsets = [0, 128], sizes = [8, 128], strides = [1, 1]} : vector<8x512xf32> to vector<8x128xf32>
    %65 = arith.negf %64 : vector<8x128xf32>
    %66 = math.exp %65 : vector<8x128xf32>
    %cst_20 = arith.constant 1.000000e+00 : f32
    %67 = vector.broadcast %cst_20 : f32 to vector<8x128xf32>
    %68 = arith.addf %67, %66 : vector<8x128xf32>
    %69 = arith.divf %67, %68 : vector<8x128xf32>
    %70 = vector.extract_strided_slice %57 {offsets = [0, 256], sizes = [8, 128], strides = [1, 1]} : vector<8x512xf32> to vector<8x128xf32>
    %71 = math.tanh %70 : vector<8x128xf32>
    %72 = vector.extract_strided_slice %57 {offsets = [0, 384], sizes = [8, 128], strides = [1, 1]} : vector<8x512xf32> to vector<8x128xf32>
    %73 = arith.negf %72 : vector<8x128xf32>
    %74 = math.exp %73 : vector<8x128xf32>
    %cst_21 = arith.constant 1.000000e+00 : f32
    %75 = vector.broadcast %cst_21 : f32 to vector<8x128xf32>
    %76 = arith.addf %75, %74 : vector<8x128xf32>
    %77 = arith.divf %75, %76 : vector<8x128xf32>
    %78 = arith.mulf %69, %46 : vector<8x128xf32>
    %79 = arith.mulf %63, %71 : vector<8x128xf32>
    %80 = arith.addf %78, %79 : vector<8x128xf32>
    %81 = math.tanh %80 : vector<8x128xf32>
    %82 = arith.mulf %77, %81 : vector<8x128xf32>
    %83 = vector.broadcast %c1_i32 : i32 to vector<8x1xi32>
    %84 = arith.cmpi slt, %83, %6 : vector<8x1xi32>
    %85 = vector.shape_cast %84 : vector<8x1xi1> to vector<8x1xi1>
    %86 = vector.broadcast %85 : vector<8x1xi1> to vector<8x128xi1>
    %87 = arith.select %86, %80, %46 : vector<8x128xi1>, vector<8x128xf32>
    %88 = vector.shape_cast %84 : vector<8x1xi1> to vector<8x1xi1>
    %89 = vector.broadcast %88 : vector<8x1xi1> to vector<8x128xi1>
    %90 = arith.select %89, %82, %49 : vector<8x128xi1>, vector<8x128xf32>
    %c2_i32 = arith.constant 2 : i32
    %91 = arith.index_cast %c2_i32 : i32 to index
    %c0_22 = arith.constant 0 : index
    %c0_23 = arith.constant 0 : index
    %92 = vector.load %arg3[%91, %c0_22, %c0_23] : memref<8x8x512xbf16, #tpu.memory_space<vmem>>, vector<1x8x512xbf16>
    %93 = vector.shape_cast %92 : vector<1x8x512xbf16> to vector<8x512xbf16>
    %94 = arith.extf %93 : vector<8x512xbf16> to vector<8x512xf32>
    %95 = arith.truncf %90 : vector<8x128xf32> to vector<8x128xbf16>
    %c0_24 = arith.constant 0 : index
    %c0_25 = arith.constant 0 : index
    %96 = vector.load %arg4[%c0_24, %c0_25] : memref<128x512xbf16, #tpu.memory_space<vmem>>, vector<128x512xbf16>
    %cst_26 = arith.constant dense<0.000000e+00> : vector<8x512xf32>
    %97 = tpu.matmul %95, %96, %cst_26 {dimension_numbers = #tpu.dot_dimension_numbers<[1], [0], [0], [1], [0, 0, 1, 1], [], []>} : vector<8x128xbf16>, vector<128x512xbf16>, vector<8x512xf32> -> vector<8x512xf32>
    %98 = arith.addf %94, %97 : vector<8x512xf32>
    %99 = vector.extract_strided_slice %98 {offsets = [0, 0], sizes = [8, 128], strides = [1, 1]} : vector<8x512xf32> to vector<8x128xf32>
    %100 = arith.negf %99 : vector<8x128xf32>
    %101 = math.exp %100 : vector<8x128xf32>
    %cst_27 = arith.constant 1.000000e+00 : f32
    %102 = vector.broadcast %cst_27 : f32 to vector<8x128xf32>
    %103 = arith.addf %102, %101 : vector<8x128xf32>
    %104 = arith.divf %102, %103 : vector<8x128xf32>
    %105 = vector.extract_strided_slice %98 {offsets = [0, 128], sizes = [8, 128], strides = [1, 1]} : vector<8x512xf32> to vector<8x128xf32>
    %106 = arith.negf %105 : vector<8x128xf32>
    %107 = math.exp %106 : vector<8x128xf32>
    %cst_28 = arith.constant 1.000000e+00 : f32
    %108 = vector.broadcast %cst_28 : f32 to vector<8x128xf32>
    %109 = arith.addf %108, %107 : vector<8x128xf32>
    %110 = arith.divf %108, %109 : vector<8x128xf32>
    %111 = vector.extract_strided_slice %98 {offsets = [0, 256], sizes = [8, 128], strides = [1, 1]} : vector<8x512xf32> to vector<8x128xf32>
    %112 = math.tanh %111 : vector<8x128xf32>
    %113 = vector.extract_strided_slice %98 {offsets = [0, 384], sizes = [8, 128], strides = [1, 1]} : vector<8x512xf32> to vector<8x128xf32>
    %114 = arith.negf %113 : vector<8x128xf32>
    %115 = math.exp %114 : vector<8x128xf32>
    %cst_29 = arith.constant 1.000000e+00 : f32
    %116 = vector.broadcast %cst_29 : f32 to vector<8x128xf32>
    %117 = arith.addf %116, %115 : vector<8x128xf32>
    %118 = arith.divf %116, %117 : vector<8x128xf32>
    %119 = arith.mulf %110, %87 : vector<8x128xf32>
    %120 = arith.mulf %104, %112 : vector<8x128xf32>
    %121 = arith.addf %119, %120 : vector<8x128xf32>
    %122 = math.tanh %121 : vector<8x128xf32>
    %123 = arith.mulf %118, %122 : vector<8x128xf32>
    %124 = vector.broadcast %c2_i32 : i32 to vector<8x1xi32>
    %125 = arith.cmpi slt, %124, %6 : vector<8x1xi32>
    %126 = vector.shape_cast %125 : vector<8x1xi1> to vector<8x1xi1>
    %127 = vector.broadcast %126 : vector<8x1xi1> to vector<8x128xi1>
    %128 = arith.select %127, %121, %87 : vector<8x128xi1>, vector<8x128xf32>
    %129 = vector.shape_cast %125 : vector<8x1xi1> to vector<8x1xi1>
    %130 = vector.broadcast %129 : vector<8x1xi1> to vector<8x128xi1>
    %131 = arith.select %130, %123, %90 : vector<8x128xi1>, vector<8x128xf32>
    %c3_i32 = arith.constant 3 : i32
    %132 = arith.index_cast %c3_i32 : i32 to index
    %c0_30 = arith.constant 0 : index
    %c0_31 = arith.constant 0 : index
    %133 = vector.load %arg3[%132, %c0_30, %c0_31] : memref<8x8x512xbf16, #tpu.memory_space<vmem>>, vector<1x8x512xbf16>
    %134 = vector.shape_cast %133 : vector<1x8x512xbf16> to vector<8x512xbf16>
    %135 = arith.extf %134 : vector<8x512xbf16> to vector<8x512xf32>
    %136 = arith.truncf %131 : vector<8x128xf32> to vector<8x128xbf16>
    %c0_32 = arith.constant 0 : index
    %c0_33 = arith.constant 0 : index
    %137 = vector.load %arg4[%c0_32, %c0_33] : memref<128x512xbf16, #tpu.memory_space<vmem>>, vector<128x512xbf16>
    %cst_34 = arith.constant dense<0.000000e+00> : vector<8x512xf32>
    %138 = tpu.matmul %136, %137, %cst_34 {dimension_numbers = #tpu.dot_dimension_numbers<[1], [0], [0], [1], [0, 0, 1, 1], [], []>} : vector<8x128xbf16>, vector<128x512xbf16>, vector<8x512xf32> -> vector<8x512xf32>
    %139 = arith.addf %135, %138 : vector<8x512xf32>
    %140 = vector.extract_strided_slice %139 {offsets = [0, 0], sizes = [8, 128], strides = [1, 1]} : vector<8x512xf32> to vector<8x128xf32>
    %141 = arith.negf %140 : vector<8x128xf32>
    %142 = math.exp %141 : vector<8x128xf32>
    %cst_35 = arith.constant 1.000000e+00 : f32
    %143 = vector.broadcast %cst_35 : f32 to vector<8x128xf32>
    %144 = arith.addf %143, %142 : vector<8x128xf32>
    %145 = arith.divf %143, %144 : vector<8x128xf32>
    %146 = vector.extract_strided_slice %139 {offsets = [0, 128], sizes = [8, 128], strides = [1, 1]} : vector<8x512xf32> to vector<8x128xf32>
    %147 = arith.negf %146 : vector<8x128xf32>
    %148 = math.exp %147 : vector<8x128xf32>
    %cst_36 = arith.constant 1.000000e+00 : f32
    %149 = vector.broadcast %cst_36 : f32 to vector<8x128xf32>
    %150 = arith.addf %149, %148 : vector<8x128xf32>
    %151 = arith.divf %149, %150 : vector<8x128xf32>
    %152 = vector.extract_strided_slice %139 {offsets = [0, 256], sizes = [8, 128], strides = [1, 1]} : vector<8x512xf32> to vector<8x128xf32>
    %153 = math.tanh %152 : vector<8x128xf32>
    %154 = vector.extract_strided_slice %139 {offsets = [0, 384], sizes = [8, 128], strides = [1, 1]} : vector<8x512xf32> to vector<8x128xf32>
    %155 = arith.negf %154 : vector<8x128xf32>
    %156 = math.exp %155 : vector<8x128xf32>
    %cst_37 = arith.constant 1.000000e+00 : f32
    %157 = vector.broadcast %cst_37 : f32 to vector<8x128xf32>
    %158 = arith.addf %157, %156 : vector<8x128xf32>
    %159 = arith.divf %157, %158 : vector<8x128xf32>
    %160 = arith.mulf %151, %128 : vector<8x128xf32>
    %161 = arith.mulf %145, %153 : vector<8x128xf32>
    %162 = arith.addf %160, %161 : vector<8x128xf32>
    %163 = math.tanh %162 : vector<8x128xf32>
    %164 = arith.mulf %159, %163 : vector<8x128xf32>
    %165 = vector.broadcast %c3_i32 : i32 to vector<8x1xi32>
    %166 = arith.cmpi slt, %165, %6 : vector<8x1xi32>
    %167 = vector.shape_cast %166 : vector<8x1xi1> to vector<8x1xi1>
    %168 = vector.broadcast %167 : vector<8x1xi1> to vector<8x128xi1>
    %169 = arith.select %168, %162, %128 : vector<8x128xi1>, vector<8x128xf32>
    %170 = vector.shape_cast %166 : vector<8x1xi1> to vector<8x1xi1>
    %171 = vector.broadcast %170 : vector<8x1xi1> to vector<8x128xi1>
    %172 = arith.select %171, %164, %131 : vector<8x128xi1>, vector<8x128xf32>
    %c4_i32 = arith.constant 4 : i32
    %173 = arith.index_cast %c4_i32 : i32 to index
    %c0_38 = arith.constant 0 : index
    %c0_39 = arith.constant 0 : index
    %174 = vector.load %arg3[%173, %c0_38, %c0_39] : memref<8x8x512xbf16, #tpu.memory_space<vmem>>, vector<1x8x512xbf16>
    %175 = vector.shape_cast %174 : vector<1x8x512xbf16> to vector<8x512xbf16>
    %176 = arith.extf %175 : vector<8x512xbf16> to vector<8x512xf32>
    %177 = arith.truncf %172 : vector<8x128xf32> to vector<8x128xbf16>
    %c0_40 = arith.constant 0 : index
    %c0_41 = arith.constant 0 : index
    %178 = vector.load %arg4[%c0_40, %c0_41] : memref<128x512xbf16, #tpu.memory_space<vmem>>, vector<128x512xbf16>
    %cst_42 = arith.constant dense<0.000000e+00> : vector<8x512xf32>
    %179 = tpu.matmul %177, %178, %cst_42 {dimension_numbers = #tpu.dot_dimension_numbers<[1], [0], [0], [1], [0, 0, 1, 1], [], []>} : vector<8x128xbf16>, vector<128x512xbf16>, vector<8x512xf32> -> vector<8x512xf32>
    %180 = arith.addf %176, %179 : vector<8x512xf32>
    %181 = vector.extract_strided_slice %180 {offsets = [0, 0], sizes = [8, 128], strides = [1, 1]} : vector<8x512xf32> to vector<8x128xf32>
    %182 = arith.negf %181 : vector<8x128xf32>
    %183 = math.exp %182 : vector<8x128xf32>
    %cst_43 = arith.constant 1.000000e+00 : f32
    %184 = vector.broadcast %cst_43 : f32 to vector<8x128xf32>
    %185 = arith.addf %184, %183 : vector<8x128xf32>
    %186 = arith.divf %184, %185 : vector<8x128xf32>
    %187 = vector.extract_strided_slice %180 {offsets = [0, 128], sizes = [8, 128], strides = [1, 1]} : vector<8x512xf32> to vector<8x128xf32>
    %188 = arith.negf %187 : vector<8x128xf32>
    %189 = math.exp %188 : vector<8x128xf32>
    %cst_44 = arith.constant 1.000000e+00 : f32
    %190 = vector.broadcast %cst_44 : f32 to vector<8x128xf32>
    %191 = arith.addf %190, %189 : vector<8x128xf32>
    %192 = arith.divf %190, %191 : vector<8x128xf32>
    %193 = vector.extract_strided_slice %180 {offsets = [0, 256], sizes = [8, 128], strides = [1, 1]} : vector<8x512xf32> to vector<8x128xf32>
    %194 = math.tanh %193 : vector<8x128xf32>
    %195 = vector.extract_strided_slice %180 {offsets = [0, 384], sizes = [8, 128], strides = [1, 1]} : vector<8x512xf32> to vector<8x128xf32>
    %196 = arith.negf %195 : vector<8x128xf32>
    %197 = math.exp %196 : vector<8x128xf32>
    %cst_45 = arith.constant 1.000000e+00 : f32
    %198 = vector.broadcast %cst_45 : f32 to vector<8x128xf32>
    %199 = arith.addf %198, %197 : vector<8x128xf32>
    %200 = arith.divf %198, %199 : vector<8x128xf32>
    %201 = arith.mulf %192, %169 : vector<8x128xf32>
    %202 = arith.mulf %186, %194 : vector<8x128xf32>
    %203 = arith.addf %201, %202 : vector<8x128xf32>
    %204 = math.tanh %203 : vector<8x128xf32>
    %205 = arith.mulf %200, %204 : vector<8x128xf32>
    %206 = vector.broadcast %c4_i32 : i32 to vector<8x1xi32>
    %207 = arith.cmpi slt, %206, %6 : vector<8x1xi32>
    %208 = vector.shape_cast %207 : vector<8x1xi1> to vector<8x1xi1>
    %209 = vector.broadcast %208 : vector<8x1xi1> to vector<8x128xi1>
    %210 = arith.select %209, %203, %169 : vector<8x128xi1>, vector<8x128xf32>
    %211 = vector.shape_cast %207 : vector<8x1xi1> to vector<8x1xi1>
    %212 = vector.broadcast %211 : vector<8x1xi1> to vector<8x128xi1>
    %213 = arith.select %212, %205, %172 : vector<8x128xi1>, vector<8x128xf32>
    %c5_i32 = arith.constant 5 : i32
    %214 = arith.index_cast %c5_i32 : i32 to index
    %c0_46 = arith.constant 0 : index
    %c0_47 = arith.constant 0 : index
    %215 = vector.load %arg3[%214, %c0_46, %c0_47] : memref<8x8x512xbf16, #tpu.memory_space<vmem>>, vector<1x8x512xbf16>
    %216 = vector.shape_cast %215 : vector<1x8x512xbf16> to vector<8x512xbf16>
    %217 = arith.extf %216 : vector<8x512xbf16> to vector<8x512xf32>
    %218 = arith.truncf %213 : vector<8x128xf32> to vector<8x128xbf16>
    %c0_48 = arith.constant 0 : index
    %c0_49 = arith.constant 0 : index
    %219 = vector.load %arg4[%c0_48, %c0_49] : memref<128x512xbf16, #tpu.memory_space<vmem>>, vector<128x512xbf16>
    %cst_50 = arith.constant dense<0.000000e+00> : vector<8x512xf32>
    %220 = tpu.matmul %218, %219, %cst_50 {dimension_numbers = #tpu.dot_dimension_numbers<[1], [0], [0], [1], [0, 0, 1, 1], [], []>} : vector<8x128xbf16>, vector<128x512xbf16>, vector<8x512xf32> -> vector<8x512xf32>
    %221 = arith.addf %217, %220 : vector<8x512xf32>
    %222 = vector.extract_strided_slice %221 {offsets = [0, 0], sizes = [8, 128], strides = [1, 1]} : vector<8x512xf32> to vector<8x128xf32>
    %223 = arith.negf %222 : vector<8x128xf32>
    %224 = math.exp %223 : vector<8x128xf32>
    %cst_51 = arith.constant 1.000000e+00 : f32
    %225 = vector.broadcast %cst_51 : f32 to vector<8x128xf32>
    %226 = arith.addf %225, %224 : vector<8x128xf32>
    %227 = arith.divf %225, %226 : vector<8x128xf32>
    %228 = vector.extract_strided_slice %221 {offsets = [0, 128], sizes = [8, 128], strides = [1, 1]} : vector<8x512xf32> to vector<8x128xf32>
    %229 = arith.negf %228 : vector<8x128xf32>
    %230 = math.exp %229 : vector<8x128xf32>
    %cst_52 = arith.constant 1.000000e+00 : f32
    %231 = vector.broadcast %cst_52 : f32 to vector<8x128xf32>
    %232 = arith.addf %231, %230 : vector<8x128xf32>
    %233 = arith.divf %231, %232 : vector<8x128xf32>
    %234 = vector.extract_strided_slice %221 {offsets = [0, 256], sizes = [8, 128], strides = [1, 1]} : vector<8x512xf32> to vector<8x128xf32>
    %235 = math.tanh %234 : vector<8x128xf32>
    %236 = vector.extract_strided_slice %221 {offsets = [0, 384], sizes = [8, 128], strides = [1, 1]} : vector<8x512xf32> to vector<8x128xf32>
    %237 = arith.negf %236 : vector<8x128xf32>
    %238 = math.exp %237 : vector<8x128xf32>
    %cst_53 = arith.constant 1.000000e+00 : f32
    %239 = vector.broadcast %cst_53 : f32 to vector<8x128xf32>
    %240 = arith.addf %239, %238 : vector<8x128xf32>
    %241 = arith.divf %239, %240 : vector<8x128xf32>
    %242 = arith.mulf %233, %210 : vector<8x128xf32>
    %243 = arith.mulf %227, %235 : vector<8x128xf32>
    %244 = arith.addf %242, %243 : vector<8x128xf32>
    %245 = math.tanh %244 : vector<8x128xf32>
    %246 = arith.mulf %241, %245 : vector<8x128xf32>
    %247 = vector.broadcast %c5_i32 : i32 to vector<8x1xi32>
    %248 = arith.cmpi slt, %247, %6 : vector<8x1xi32>
    %249 = vector.shape_cast %248 : vector<8x1xi1> to vector<8x1xi1>
    %250 = vector.broadcast %249 : vector<8x1xi1> to vector<8x128xi1>
    %251 = arith.select %250, %244, %210 : vector<8x128xi1>, vector<8x128xf32>
    %252 = vector.shape_cast %248 : vector<8x1xi1> to vector<8x1xi1>
    %253 = vector.broadcast %252 : vector<8x1xi1> to vector<8x128xi1>
    %254 = arith.select %253, %246, %213 : vector<8x128xi1>, vector<8x128xf32>
    %c6_i32 = arith.constant 6 : i32
    %255 = arith.index_cast %c6_i32 : i32 to index
    %c0_54 = arith.constant 0 : index
    %c0_55 = arith.constant 0 : index
    %256 = vector.load %arg3[%255, %c0_54, %c0_55] : memref<8x8x512xbf16, #tpu.memory_space<vmem>>, vector<1x8x512xbf16>
    %257 = vector.shape_cast %256 : vector<1x8x512xbf16> to vector<8x512xbf16>
    %258 = arith.extf %257 : vector<8x512xbf16> to vector<8x512xf32>
    %259 = arith.truncf %254 : vector<8x128xf32> to vector<8x128xbf16>
    %c0_56 = arith.constant 0 : index
    %c0_57 = arith.constant 0 : index
    %260 = vector.load %arg4[%c0_56, %c0_57] : memref<128x512xbf16, #tpu.memory_space<vmem>>, vector<128x512xbf16>
    %cst_58 = arith.constant dense<0.000000e+00> : vector<8x512xf32>
    %261 = tpu.matmul %259, %260, %cst_58 {dimension_numbers = #tpu.dot_dimension_numbers<[1], [0], [0], [1], [0, 0, 1, 1], [], []>} : vector<8x128xbf16>, vector<128x512xbf16>, vector<8x512xf32> -> vector<8x512xf32>
    %262 = arith.addf %258, %261 : vector<8x512xf32>
    %263 = vector.extract_strided_slice %262 {offsets = [0, 0], sizes = [8, 128], strides = [1, 1]} : vector<8x512xf32> to vector<8x128xf32>
    %264 = arith.negf %263 : vector<8x128xf32>
    %265 = math.exp %264 : vector<8x128xf32>
    %cst_59 = arith.constant 1.000000e+00 : f32
    %266 = vector.broadcast %cst_59 : f32 to vector<8x128xf32>
    %267 = arith.addf %266, %265 : vector<8x128xf32>
    %268 = arith.divf %266, %267 : vector<8x128xf32>
    %269 = vector.extract_strided_slice %262 {offsets = [0, 128], sizes = [8, 128], strides = [1, 1]} : vector<8x512xf32> to vector<8x128xf32>
    %270 = arith.negf %269 : vector<8x128xf32>
    %271 = math.exp %270 : vector<8x128xf32>
    %cst_60 = arith.constant 1.000000e+00 : f32
    %272 = vector.broadcast %cst_60 : f32 to vector<8x128xf32>
    %273 = arith.addf %272, %271 : vector<8x128xf32>
    %274 = arith.divf %272, %273 : vector<8x128xf32>
    %275 = vector.extract_strided_slice %262 {offsets = [0, 256], sizes = [8, 128], strides = [1, 1]} : vector<8x512xf32> to vector<8x128xf32>
    %276 = math.tanh %275 : vector<8x128xf32>
    %277 = vector.extract_strided_slice %262 {offsets = [0, 384], sizes = [8, 128], strides = [1, 1]} : vector<8x512xf32> to vector<8x128xf32>
    %278 = arith.negf %277 : vector<8x128xf32>
    %279 = math.exp %278 : vector<8x128xf32>
    %cst_61 = arith.constant 1.000000e+00 : f32
    %280 = vector.broadcast %cst_61 : f32 to vector<8x128xf32>
    %281 = arith.addf %280, %279 : vector<8x128xf32>
    %282 = arith.divf %280, %281 : vector<8x128xf32>
    %283 = arith.mulf %274, %251 : vector<8x128xf32>
    %284 = arith.mulf %268, %276 : vector<8x128xf32>
    %285 = arith.addf %283, %284 : vector<8x128xf32>
    %286 = math.tanh %285 : vector<8x128xf32>
    %287 = arith.mulf %282, %286 : vector<8x128xf32>
    %288 = vector.broadcast %c6_i32 : i32 to vector<8x1xi32>
    %289 = arith.cmpi slt, %288, %6 : vector<8x1xi32>
    %290 = vector.shape_cast %289 : vector<8x1xi1> to vector<8x1xi1>
    %291 = vector.broadcast %290 : vector<8x1xi1> to vector<8x128xi1>
    %292 = arith.select %291, %285, %251 : vector<8x128xi1>, vector<8x128xf32>
    %293 = vector.shape_cast %289 : vector<8x1xi1> to vector<8x1xi1>
    %294 = vector.broadcast %293 : vector<8x1xi1> to vector<8x128xi1>
    %295 = arith.select %294, %287, %254 : vector<8x128xi1>, vector<8x128xf32>
    %c7_i32 = arith.constant 7 : i32
    %296 = arith.index_cast %c7_i32 : i32 to index
    %c0_62 = arith.constant 0 : index
    %c0_63 = arith.constant 0 : index
    %297 = vector.load %arg3[%296, %c0_62, %c0_63] : memref<8x8x512xbf16, #tpu.memory_space<vmem>>, vector<1x8x512xbf16>
    %298 = vector.shape_cast %297 : vector<1x8x512xbf16> to vector<8x512xbf16>
    %299 = arith.extf %298 : vector<8x512xbf16> to vector<8x512xf32>
    %300 = arith.truncf %295 : vector<8x128xf32> to vector<8x128xbf16>
    %c0_64 = arith.constant 0 : index
    %c0_65 = arith.constant 0 : index
    %301 = vector.load %arg4[%c0_64, %c0_65] : memref<128x512xbf16, #tpu.memory_space<vmem>>, vector<128x512xbf16>
    %cst_66 = arith.constant dense<0.000000e+00> : vector<8x512xf32>
    %302 = tpu.matmul %300, %301, %cst_66 {dimension_numbers = #tpu.dot_dimension_numbers<[1], [0], [0], [1], [0, 0, 1, 1], [], []>} : vector<8x128xbf16>, vector<128x512xbf16>, vector<8x512xf32> -> vector<8x512xf32>
    %303 = arith.addf %299, %302 : vector<8x512xf32>
    %304 = vector.extract_strided_slice %303 {offsets = [0, 0], sizes = [8, 128], strides = [1, 1]} : vector<8x512xf32> to vector<8x128xf32>
    %305 = arith.negf %304 : vector<8x128xf32>
    %306 = math.exp %305 : vector<8x128xf32>
    %cst_67 = arith.constant 1.000000e+00 : f32
    %307 = vector.broadcast %cst_67 : f32 to vector<8x128xf32>
    %308 = arith.addf %307, %306 : vector<8x128xf32>
    %309 = arith.divf %307, %308 : vector<8x128xf32>
    %310 = vector.extract_strided_slice %303 {offsets = [0, 128], sizes = [8, 128], strides = [1, 1]} : vector<8x512xf32> to vector<8x128xf32>
    %311 = arith.negf %310 : vector<8x128xf32>
    %312 = math.exp %311 : vector<8x128xf32>
    %cst_68 = arith.constant 1.000000e+00 : f32
    %313 = vector.broadcast %cst_68 : f32 to vector<8x128xf32>
    %314 = arith.addf %313, %312 : vector<8x128xf32>
    %315 = arith.divf %313, %314 : vector<8x128xf32>
    %316 = vector.extract_strided_slice %303 {offsets = [0, 256], sizes = [8, 128], strides = [1, 1]} : vector<8x512xf32> to vector<8x128xf32>
    %317 = math.tanh %316 : vector<8x128xf32>
    %318 = vector.extract_strided_slice %303 {offsets = [0, 384], sizes = [8, 128], strides = [1, 1]} : vector<8x512xf32> to vector<8x128xf32>
    %319 = arith.negf %318 : vector<8x128xf32>
    %320 = math.exp %319 : vector<8x128xf32>
    %cst_69 = arith.constant 1.000000e+00 : f32
    %321 = vector.broadcast %cst_69 : f32 to vector<8x128xf32>
    %322 = arith.addf %321, %320 : vector<8x128xf32>
    %323 = arith.divf %321, %322 : vector<8x128xf32>
    %324 = arith.mulf %315, %292 : vector<8x128xf32>
    %325 = arith.mulf %309, %317 : vector<8x128xf32>
    %326 = arith.addf %324, %325 : vector<8x128xf32>
    %327 = math.tanh %326 : vector<8x128xf32>
    %328 = arith.mulf %323, %327 : vector<8x128xf32>
    %329 = vector.broadcast %c7_i32 : i32 to vector<8x1xi32>
    %330 = arith.cmpi slt, %329, %6 : vector<8x1xi32>
    %331 = vector.shape_cast %330 : vector<8x1xi1> to vector<8x1xi1>
    %332 = vector.broadcast %331 : vector<8x1xi1> to vector<8x128xi1>
    %333 = arith.select %332, %326, %292 : vector<8x128xi1>, vector<8x128xf32>
    %334 = vector.shape_cast %330 : vector<8x1xi1> to vector<8x1xi1>
    %335 = vector.broadcast %334 : vector<8x1xi1> to vector<8x128xi1>
    %336 = arith.select %335, %328, %295 : vector<8x128xi1>, vector<8x128xf32>
    %c8_i32_70 = arith.constant 8 : i32
    %c0_71 = arith.constant 0 : index
    %c0_72 = arith.constant 0 : index
    %337 = vector.load %arg8[%c0_71, %c0_72] : memref<8x128xf32, #tpu.memory_space<vmem>>, vector<8x128xf32>
    tpu.vector_store %arg8[%c0_71, %c0_72], %336 {strides = array<i32>} : memref<8x128xf32, #tpu.memory_space<vmem>>, vector<8x128xf32>,
    %c0_73 = arith.constant 0 : index
    %c0_74 = arith.constant 0 : index
    %338 = vector.load %arg9[%c0_73, %c0_74] : memref<8x128xf32, #tpu.memory_space<vmem>>, vector<8x128xf32>
    tpu.vector_store %arg9[%c0_73, %c0_74], %333 {strides = array<i32>} : memref<8x128xf32, #tpu.memory_space<vmem>>, vector<8x128xf32>,
    %c0_i32_75 = arith.constant 0 : i32
    %339 = arith.cmpi eq, %arg1, %c0_i32_75 : i32
    %340 = arith.extui %339 : i1 to i32
    %c0_i32_76 = arith.constant 0 : i32
    %341 = arith.cmpi ne, %340, %c0_i32_76 : i32
    scf.if %341 {
      %c0_77 = arith.constant 0 : index
      %c0_78 = arith.constant 0 : index
      %342 = vector.load %arg8[%c0_77, %c0_78] : memref<8x128xf32, #tpu.memory_space<vmem>>, vector<8x128xf32>
      %c0_79 = arith.constant 0 : index
      %c0_80 = arith.constant 0 : index
      %343 = vector.load %arg5[%c0_79, %c0_80] : memref<128x128xf32, #tpu.memory_space<vmem>>, vector<128x128xf32>
      %cst_81 = arith.constant dense<0.000000e+00> : vector<8x128xf32>
      %344 = tpu.matmul %342, %343, %cst_81 {dimension_numbers = #tpu.dot_dimension_numbers<[1], [0], [0], [1], [0, 0, 1, 1], [], []>} : vector<8x128xf32>, vector<128x128xf32>, vector<8x128xf32> -> vector<8x128xf32>
      %c0_82 = arith.constant 0 : index
      %c0_83 = arith.constant 0 : index
      %345 = vector.load %arg6[%c0_82, %c0_83] : memref<1x128xf32, #tpu.memory_space<vmem>>, vector<1x128xf32>
      %346 = vector.broadcast %345 : vector<1x128xf32> to vector<8x128xf32>
      %347 = arith.addf %344, %346 : vector<8x128xf32>
      %c0_84 = arith.constant 0 : index
      %c0_85 = arith.constant 0 : index
      %348 = vector.load %arg7[%c0_84, %c0_85] : memref<8x128xf32, #tpu.memory_space<vmem>>, vector<8x128xf32>
      tpu.vector_store %arg7[%c0_84, %c0_85], %347 {strides = array<i32>} : memref<8x128xf32, #tpu.memory_space<vmem>>, vector<8x128xf32>,
    } else {
    }
    return
  }
  func.func @transform_0(%arg0: i32, %arg1: i32) -> (i32, i32) {
    %c0_i32 = arith.constant 0 : i32
    %c0_i32_0 = arith.constant 0 : i32
    return %arg0, %c0_i32 : i32, i32
  }
  func.func @transform_1(%arg0: i32, %arg1: i32) -> (i32, i32, i32) {
    %c0_i32 = arith.constant 0 : i32
    %c0_i32_0 = arith.constant 0 : i32
    return %arg1, %arg0, %c0_i32 : i32, i32, i32
  }
  func.func @transform_2(%arg0: i32, %arg1: i32) -> (i32, i32) {
    %c0_i32 = arith.constant 0 : i32
    %c0_i32_0 = arith.constant 0 : i32
    %c0_i32_1 = arith.constant 0 : i32
    return %c0_i32, %c0_i32_0 : i32, i32
  }
  func.func @transform_3(%arg0: i32, %arg1: i32) -> (i32, i32) {
    %c0_i32 = arith.constant 0 : i32
    %c0_i32_0 = arith.constant 0 : i32
    %c0_i32_1 = arith.constant 0 : i32
    return %c0_i32, %c0_i32_0 : i32, i32
  }
  func.func @transform_4(%arg0: i32, %arg1: i32) -> (i32, i32) {
    %c0_i32 = arith.constant 0 : i32
    %c0_i32_0 = arith.constant 0 : i32
    %c0_i32_1 = arith.constant 0 : i32
    return %c0_i32, %c0_i32_0 : i32, i32
  }
  func.func @transform_5(%arg0: i32, %arg1: i32) -> (i32, i32) {
    %c0_i32 = arith.constant 0 : i32
    %c0_i32_0 = arith.constant 0 : i32
    return %arg0, %c0_i32 : i32, i32
  }
}

</mosaic_0001>

<bundles_post_ra>
// kernel: tpu_custom_call.1
= control target key start
LH: loop header
LB: loop body
LE: loop exit
PB: predicated region body
PF: predicated region fallthrough
CT: control target
= control target key end

     0   :  { %10 = vsyncpa [#allocation5], 0  ;;  %s2402_s0 = inlined_call_operand.vmem [shape: s32[8,1], index: 0, kind: input, shape index: {}]   ;;  %s2403_s1 = inlined_call_operand.hbm [shape: bf16[8,8,512], index: 1, kind: input, shape index: {}]   ;;  %s2404_s2 = inlined_call_operand.hbm [shape: bf16[128,512], index: 2, kind: input, shape index: {}]   ;;  %s2405_s3 = inlined_call_operand.hbm [shape: f32[128,128], index: 3, kind: input, shape index: {}]   ;;  %s2406_s4 = inlined_call_operand.vmem [shape: f32[1,128], index: 4, kind: input, shape index: {}]   ;;  %s2407_s5 = inlined_call_operand.hbm [shape: f32[8,128], index: 5, kind: output, shape index: {}]  }
   0x1   :  { %11 = vsyncpa [#allocation8], 0 }
   0x2   :  { %12 = vsyncpa [#allocation6], 0  ;;  %s1845_s18 = smov [#allocation7]   ;;  %s1846_s20 = smov [#allocation4]  }
   0x3   :  { %s32_s19 = sshll.u32 %s1845_s18, 4  ;;  %s20_s21 = sshll.u32 %s1846_s20, 4  ;;  %s33_s19 = int_to_ptr.vmem [resolvable:$true] %s32_s19  ;;  %s1887_s21 = int_to_ptr.vmem [resolvable:$true] %s20_s21 }
   0x4   :  { %s1751_s24 = scalar_lea.hbm %s2404_s2, 4096 }
   0x5   :  { %p1752_p0 = scmp.ne.s32.totalorder %s2404_s2, %s1751_s24  ;;  %p1755_p1 = scmp.lt.u32.totalorder %s1751_s24, %s2404_s2 }
   0x7   :  { %p1757_p2 = pnand %p1755_p1, %p1752_p0 }
   0x9   :  { %1760 = shalt.err (!%p1757_p2)
}
   0xa   :  { %s1761_s29 = scalar_lea.vmem %s33_s19, 4096  ;;  %p1766_p4 = scmp.lt.s32.totalorder %s33_s19, %s33_s19 }
   0xb   :  { %p1762_p3 = scmp.ne.s32.totalorder %s33_s19, %s1761_s29  ;;  %p1767_p5 = scmp.lt.s32.totalorder %s1761_s29, %s1761_s29 }
   0xd   :  { %p1768_p6 = por %p1767_p5, %p1766_p4 }
   0xf   :  { %p1769_p7 = pnand %p1768_p6, %p1762_p3 }
  0x11   :  { %1772 = shalt.err (!%p1769_p7)
}
  0x12   :  { %s1847_s30 = smov 256   ;;  %s1848_s6 = smov 16  }
  0x13   :  { %38 = dma.hbm_to_vmem [thread:$0]  %s2404_s2, 4096, %s33_s19, [#allocation8], %s1847_s30, %s1847_s30, %s1848_s6  }
  0x14   :  { %s1773_s11 = scalar_lea.hbm %s2403_s1, 2048 }
  0x15   :  { %p1774_p8 = scmp.ne.s32.totalorder %s2403_s1, %s1773_s11  ;;  %p1777_p9 = scmp.lt.u32.totalorder %s1773_s11, %s2403_s1 }
  0x17   :  { %p1779_p10 = pnand %p1777_p9, %p1774_p8 }
  0x19   :  { %1782 = shalt.err (!%p1779_p10)
}
  0x1a   :  { %s1783_s16 = scalar_lea.vmem %s1887_s21, 2048  ;;  %p1788_p12 = scmp.lt.s32.totalorder %s1887_s21, %s1887_s21 }
  0x1b   :  { %p1784_p11 = scmp.ne.s32.totalorder %s1887_s21, %s1783_s16  ;;  %p1789_p13 = scmp.lt.s32.totalorder %s1783_s16, %s1783_s16 }
  0x1d   :  { %p1790_p0 = por %p1789_p13, %p1788_p12 }
  0x1f   :  { %p1791_p1 = pnand %p1790_p0, %p1784_p11 }
  0x21   :  { %1794 = shalt.err (!%p1791_p1)
}
  0x22   :  { %26 = dma.hbm_to_vmem [thread:$0]  %s2403_s1, 2048, %s1887_s21, [#allocation5], %s1847_s30, %s1847_s30, %s1848_s6  }
  0x23   :  { %s1849_s18 = smov [#allocation9]   ;;  %s1795_s23 = scalar_lea.hbm %s2405_s3, 2048 }
  0x24   :  { %s44_s19 = sshll.u32 %s1849_s18, 4  ;;  %p1796_p2 = scmp.ne.s32.totalorder %s2405_s3, %s1795_s23  ;;  %s45_s19 = int_to_ptr.vmem [resolvable:$true] %s44_s19 }
  0x25   :  { %p1799_p3 = scmp.lt.u32.totalorder %s1795_s23, %s2405_s3 }
  0x27   :  { %p1801_p4 = pnand %p1799_p3, %p1796_p2 }
  0x29   :  { %1804 = shalt.err (!%p1801_p4)
}
  0x2a   :  { %s1805_s28 = scalar_lea.vmem %s45_s19, 2048  ;;  %p1810_p6 = scmp.lt.s32.totalorder %s45_s19, %s45_s19 }
  0x2b   :  { %p1806_p5 = scmp.ne.s32.totalorder %s45_s19, %s1805_s28  ;;  %p1811_p7 = scmp.lt.s32.totalorder %s1805_s28, %s1805_s28 }
  0x2d   :  { %p1812_p8 = por %p1811_p7, %p1810_p6 }
  0x2f   :  { %p1813_p9 = pnand %p1812_p8, %p1806_p5 }
  0x31   :  { %1816 = shalt.err (!%p1813_p9)
}
  0x32   :  { %s1850_s1 = smov 128   ;;  %s1851_s21 = smov 8  }
  0x33   :  { %50 = dma.hbm_to_vmem [thread:$0]  %s2405_s3, 2048, %s45_s19, [#allocation8], %s1850_s1, %s1850_s1, %s1851_s21  }
  0x34   :  { %1839 = dma.done.wait [#allocation5], 2048  }
  0x35   :  { %1840 = vsyncadd [#allocation5], 4294965248 }
  0x36   :  { %1841 = dma.done.wait [#allocation8], 6144  }
  0x37   :  { %1842 = vsyncadd [#allocation8], 4294961152  ;;  %v1852_v0 = vmov 0   ;;  %v1934_v1 = vld [vmem:[#allocation7 + $0x4] ss:$16 sps:$4 sm:$0xff]   ;;  %v1853_v37 = vmov 0.0|0.0  }
  0x38   :  { %306 = vmatprep.mubr.bf16.mxu0 %v1852_v0  ;;  %347 = vmatprep.mubr.bf16.mxu1 %v1852_v0  ;;  %v1936_v2 = vld [vmem:[#allocation7] ss:$16 sps:$4 sm:$0xff]   ;;  %v1939_v3 = vld [vmem:[#allocation7 + $0x24] ss:$16 sps:$4 sm:$0xff]   ;;  %v1947_v6 = vld [vmem:[#allocation7 + $0xc] ss:$16 sps:$4 sm:$0xff]  }
  0x39   :  { %1541 = vset.pattern.permute.xlu0 %v1852_v0  ;;  %1542 = vset.pattern.permute.xlu1 %v1852_v0  ;;  %v1942_v4 = vld [vmem:[#allocation7 + $0x20] ss:$16 sps:$4 sm:$0xff]   ;;  %v1945_v5 = vld [vmem:[#allocation7 + $0x44] ss:$16 sps:$4 sm:$0xff]   ;;  %v1949_v7 = vld [vmem:[#allocation7 + $0x8] ss:$16 sps:$4 sm:$0xff]  }
  0x3a   :  { %274 = vmatprep.subr.bf16.mxu0 %v1934_v1  ;;  %v1952_v8 = vld [vmem:[#allocation7 + $0x40] ss:$16 sps:$4 sm:$0xff]   ;;  %315 = vmatprep.subr.bf16.mxu1 %v1947_v6  ;;  %v1956_v9 = vld [vmem:[#allocation7 + $0x64] ss:$16 sps:$4 sm:$0xff]   ;;  %v1959_v10 = vld [vmem:[#allocation7 + $0x2c] ss:$16 sps:$4 sm:$0xff]  }
  0x3b   :  { %275 = vmatpush1.bf16.msra.mxu0 %v1936_v2  ;;  %316 = vmatpush1.bf16.msra.mxu1 %v1949_v7  ;;  %v1961_v11 = vld [vmem:[#allocation7 + $0x28] ss:$16 sps:$4 sm:$0xff]   ;;  %v1965_v12 = vld [vmem:[#allocation7 + $0x60] ss:$16 sps:$4 sm:$0xff]   ;;  %v1967_v13 = vld [vmem:[#allocation7 + $0x84] ss:$16 sps:$4 sm:$0xff]  }
  0x3c   :  { %276 = vmatprep.subr.bf16.mxu0 %v1939_v3  ;;  %317 = vmatprep.subr.bf16.mxu1 %v1959_v10  ;;  %v1969_v14 = vld [vmem:[#allocation7 + $0x4c] ss:$16 sps:$4 sm:$0xff]   ;;  %v1973_v15 = vld [vmem:[#allocation7 + $0x48] ss:$16 sps:$4 sm:$0xff]   ;;  %v1979_v17 = vld [vmem:[#allocation7 + $0x80] ss:$16 sps:$4 sm:$0xff]  }
  0x3d   :  { %v1976_v16 = vld [vmem:[#allocation7 + $0x6c] ss:$16 sps:$4 sm:$0xff]   ;;  %v1982_v18 = vld [vmem:[#allocation7 + $0xa4] ss:$16 sps:$4 sm:$0xff]   ;;  %v1985_v19 = vld [vmem:[#allocation7 + $0x68] ss:$16 sps:$4 sm:$0xff]  }
  0x3e   :  { %v1988_v20 = vld [vmem:[#allocation7 + $0x8c] ss:$16 sps:$4 sm:$0xff]   ;;  %v1991_v21 = vld [vmem:[#allocation7 + $0xa0] ss:$16 sps:$4 sm:$0xff]   ;;  %v1993_v22 = vld [vmem:[#allocation7 + $0xc4] ss:$16 sps:$4 sm:$0xff]  }
  0x3f   :  { %277 = vmatpush1.bf16.msra.mxu0 %v1942_v4  ;;  %318 = vmatpush1.bf16.msra.mxu1 %v1961_v11  ;;  %v1997_v23 = vld [vmem:[#allocation7 + $0x88] ss:$16 sps:$4 sm:$0xff]   ;;  %v2000_v24 = vld [vmem:[#allocation7 + $0xac] ss:$16 sps:$4 sm:$0xff]   ;;  %v2005_v25 = vld [vmem:[%s2402_s0] sm:$0xff]  ;;  %s1856_s8 = smov [#allocation10]  }
  0x40   :  { %278 = vmatprep.subr.bf16.mxu0 %v1945_v5  ;;  %319 = vmatprep.subr.bf16.mxu1 %v1969_v14  ;;  %vm384_vm0 = vcmp.gt.s32.totalorder %v2005_v25, 0  ;;  %v2009_v26 = vld [vmem:[#allocation7 + $0xc0] ss:$16 sps:$4 sm:$0xff]   ;;  %vm510_vm1 = vcmp.gt.s32.totalorder %v2005_v25, 1  ;;  %v2014_v28 = vld [vmem:[#allocation7 + $0xe4] ss:$16 sps:$4 sm:$0xff]  }
  0x41   :  { %v385_v27 = vsel %vm384_vm0, 1, %v1852_v0  ;;  %v2017_v29 = vld [vmem:[#allocation7 + $0xa8] ss:$16 sps:$4 sm:$0xff]   ;;  %v2020_v30 = vld [vmem:[#allocation7 + $0xcc] ss:$16 sps:$4 sm:$0xff]   ;;  %v511_v31 = vsel %vm510_vm1, 1, %v1852_v0 }
  0x42   :  { %387 = vperm.xlu0 %1541, %v385_v27   ;;  %v2024_v32 = vld [vmem:[#allocation7 + $0xe0] ss:$16 sps:$4 sm:$0xff]   ;;  %vm888_vm2 = vcmp.gt.s32.totalorder %v2005_v25, 4  ;;  %v2029_v33 = vld [vmem:[#allocation7 + $0xc8] ss:$16 sps:$4 sm:$0xff]   ;;  %vm1140_vm3 = vcmp.gt.s32.totalorder %v2005_v25, 6 }
  0x43   :  { %279 = vmatpush1.bf16.msra.mxu0 %v1952_v8  ;;  %320 = vmatpush1.bf16.msra.mxu1 %v1973_v15  ;;  %v2032_v34 = vld [vmem:[#allocation7 + $0xec] ss:$16 sps:$4 sm:$0xff]   ;;  %v889_v35 = vsel %vm888_vm2, 1, %v1852_v0  ;;  %v2038_v36 = vld [vmem:[#allocation7 + $0xe8] ss:$16 sps:$4 sm:$0xff]   ;;  %v1141_v38 = vsel %vm1140_vm3, 1, %v1852_v0 }
  0x44   :  { %280 = vmatprep.subr.bf16.mxu0 %v1956_v9  ;;  %321 = vmatprep.subr.bf16.mxu1 %v1976_v16  ;;  %v75_v39 = vld [vmem:[#allocation4] sm:$0xff]  ;;  %v76_v43 = vld [vmem:[#allocation4 + $0x8] sm:$0xff]  ;;  %vm636_vm6 = vcmp.gt.s32.totalorder %v2005_v25, 2  ;;  %vm762_vm7 = vcmp.gt.s32.totalorder %v2005_v25, 3  ;;  %vm1014_vm8 = vcmp.gt.s32.totalorder %v2005_v25, 5  ;;  %vm1266_vm9 = vcmp.gt.s32.totalorder %v2005_v25, 7 }
  0x45   :  { %v77_v40 = vunpack.c.l.bf16 %v75_v39  ;;  %v78_v41 = vunpack.c.h.bf16 %v75_v39  ;;  %v80_v50 = vunpack.c.h.bf16 %v76_v43  ;;  %v79_v56 = vunpack.c.l.bf16 %v76_v43  ;;  %s1380_s9 = sshll.u32 %s1856_s8, 4  ;;  %s1381_s9 = int_to_ptr.vmem [resolvable:$true] %s1380_s9 }
  0x46   :  { %513 = vperm.xlu0 %1541, %v511_v31   ;;  %vm1854_vm0 = vmmov 0   ;;  %s1817_s10 = scalar_lea.vmem %s1381_s9, 128  ;;  %p1822_p11 = scmp.lt.s32.totalorder %s1381_s9, %s1381_s9 }
  0x47   :  { %281 = vmatpush1.bf16.msra.mxu0 %v1965_v12  ;;  %322 = vmatpush1.bf16.msra.mxu1 %v1985_v19  ;;  %p1818_p10 = scmp.ne.s32.totalorder %s1381_s9, %s1817_s10  ;;  %p1823_p12 = scmp.lt.s32.totalorder %s1817_s10, %s1817_s10 }
  0x48   :  { %282 = vmatprep.subr.bf16.mxu0 %v1967_v13  ;;  %323 = vmatprep.subr.bf16.mxu1 %v1988_v20 }
  0x49   :  { %p1824_p13 = por %p1823_p12, %p1822_p11 }
  0x4a   :  { %891 = vperm.xlu0 %1541, %v889_v35  }
  0x4b   :  { %283 = vmatpush1.bf16.msra.mxu0 %v1979_v17  ;;  %324 = vmatpush1.bf16.msra.mxu1 %v1997_v23  ;;  %p1825_p0 = pnand %p1824_p13, %p1818_p10 }
  0x4c   :  { %284 = vmatprep.subr.bf16.mxu0 %v1982_v18  ;;  %325 = vmatprep.subr.bf16.mxu1 %v2000_v24 }
  0x4e   :  { %1143 = vperm.xlu0 %1541, %v1141_v38  }
  0x4f   :  { %285 = vmatpush1.bf16.msra.mxu0 %v1991_v21  ;;  %326 = vmatpush1.bf16.msra.mxu1 %v2017_v29 }
  0x50   :  { %286 = vmatprep.subr.bf16.mxu0 %v1993_v22  ;;  %327 = vmatprep.subr.bf16.mxu1 %v2020_v30 }
  0x53   :  { %287 = vmatpush1.bf16.msra.mxu0 %v2009_v26  ;;  %328 = vmatpush1.bf16.msra.mxu1 %v2029_v33 }
  0x54   :  { %288 = vmatprep.subr.bf16.mxu0 %v2014_v28  ;;  %329 = vmatprep.subr.bf16.mxu1 %v2032_v34 }
  0x57   :  { %289 = vmatpush1.bf16.msra.mxu0 %v2024_v32  ;;  %330 = vmatpush1.bf16.msra.mxu1 %v2038_v36 }
  0x58   :  { %400 = vmatprep.subr.bf16.mxu0 %v1934_v1  ;;  %441 = vmatprep.subr.bf16.mxu1 %v1947_v6 }
  0x5a   :  { %307 = vmatmul.mubr.bf16.vlgmr.msra.gmra.mrb[0].mxu0 %v1853_v37  ;;  %348 = vmatmul.mubr.bf16.vlgmr.msra.gmra.mrb[0].mxu1 %v1853_v37 }
  0x5b   :  { %401 = vmatpush1.bf16.msra.mxu0 %v1936_v2  ;;  %432 = vmatprep.mubr.bf16.mxu0 %v1852_v0 }
  0x5c   :  { %402 = vmatprep.subr.bf16.mxu0 %v1939_v3  ;;  %442 = vmatpush1.bf16.msra.mxu1 %v1949_v7 }
  0x5d   :  { %443 = vmatprep.subr.bf16.mxu1 %v1959_v10  ;;  %473 = vmatprep.mubr.bf16.mxu1 %v1852_v0 }
  0x5f   :  { %403 = vmatpush1.bf16.msra.mxu0 %v1942_v4 }
  0x60   :  { %404 = vmatprep.subr.bf16.mxu0 %v1945_v5  ;;  %444 = vmatpush1.bf16.msra.mxu1 %v1961_v11 }
  0x61   :  { %445 = vmatprep.subr.bf16.mxu1 %v1969_v14 }
  0x63   :  { %405 = vmatpush1.bf16.msra.mxu0 %v1952_v8 }
  0x64   :  { %406 = vmatprep.subr.bf16.mxu0 %v1956_v9  ;;  %446 = vmatpush1.bf16.msra.mxu1 %v1973_v15 }
  0x65   :  { %447 = vmatprep.subr.bf16.mxu1 %v1976_v16 }
  0x67   :  { %407 = vmatpush1.bf16.msra.mxu0 %v1965_v12 }
  0x68   :  { %408 = vmatprep.subr.bf16.mxu0 %v1967_v13  ;;  %448 = vmatpush1.bf16.msra.mxu1 %v1985_v19 }
  0x69   :  { %449 = vmatprep.subr.bf16.mxu1 %v1988_v20 }
  0x6b   :  { %409 = vmatpush1.bf16.msra.mxu0 %v1979_v17 }
  0x6c   :  { %410 = vmatprep.subr.bf16.mxu0 %v1982_v18  ;;  %450 = vmatpush1.bf16.msra.mxu1 %v1997_v23 }
  0x6d   :  { %451 = vmatprep.subr.bf16.mxu1 %v2000_v24 }
  0x6f   :  { %411 = vmatpush1.bf16.msra.mxu0 %v1991_v21 }
  0x70   :  { %412 = vmatprep.subr.bf16.mxu0 %v1993_v22  ;;  %452 = vmatpush1.bf16.msra.mxu1 %v2017_v29 }
  0x71   :  { %453 = vmatprep.subr.bf16.mxu1 %v2020_v30 }
  0x73   :  { %413 = vmatpush1.bf16.msra.mxu0 %v2009_v26 }
  0x74   :  { %414 = vmatprep.subr.bf16.mxu0 %v2014_v28  ;;  %454 = vmatpush1.bf16.msra.mxu1 %v2029_v33 }
  0x75   :  { %455 = vmatprep.subr.bf16.mxu1 %v2032_v34 }
  0x77   :  { %415 = vmatpush1.bf16.msra.mxu0 %v2024_v32 }
  0x78   :  { %526 = vmatprep.subr.bf16.mxu0 %v1934_v1  ;;  %456 = vmatpush1.bf16.msra.mxu1 %v2038_v36 }
  0x79   :  { %567 = vmatprep.subr.bf16.mxu1 %v1947_v6 }
 0x12d   :  { %v308_v42 = vpop.f32.mrb[0].mxu0  ;;  %v349_v52 = vpop.f32.mrb[0].mxu1 }
 0x12e   :  { %v356_v44 = vadd.f32 %v308_v42, %v77_v40  ;;  %v310_v45 = vpop.f32.mrb[1].mxu0  ;;  %v351_v53 = vpop.f32.mrb[1].mxu1  ;;  %v358_v59 = vadd.f32 %v349_v52, %v79_v56  ;;  %v393_v52 = vld [vmem:[#allocation4 + $0x10] sm:$0xff] }
 0x12f   :  { %v357_v46 = vadd.f32 %v310_v45, %v78_v41  ;;  %v312_v47 = vpop.f32.mrb[2].mxu0  ;;  %v359_v54 = vadd.f32 %v351_v53, %v80_v50  ;;  %v353_v55 = vpop.f32.mrb[2].mxu1  ;;  %v1015_v50 = vsel %vm1014_vm8, 1, %v1852_v0  ;;  %v395_v53 = vunpack.c.l.bf16 %v393_v52 }
 0x130   :  { %v1422_v48 = vmul.f32 -1.442695, %v356_v44  ;;  %v313_v49 = vpop.f32.mrb[3].mxu0  ;;  %v354_v57 = vpop.f32.mrb[3].mxu1 }
 0x131   :  { %v1423_v51 = vmul.f32 -1.442695, %v357_v46  ;;  %v1424_v58 = vmul.f32 -1.442695, %v359_v54  ;;  %v2084_v44 = vpop.permute.xlu0 %387  ;;  %v763_v49 = vsel %vm762_vm7, 1, %v1852_v0  ;;  %v396_v54 = vunpack.c.h.bf16 %v393_v52 }
 0x132   :  { %1591 = vpow2.f32 %v1422_v48  ;;  %vm389_vm4 = vcmp.eq.s32.totalorder %v2084_v44, 1  ;;  %v637_v48 = vsel %vm636_vm6, 1, %v1852_v0  ;;  %v519_v44 = vld [vmem:[#allocation4 + $0x20] sm:$0xff] }
 0x133   :  { %1593 = vpow2.f32 %v1423_v51  ;;  %vm1447_vm5 = vmpackc.low %vm389_vm4, %vm389_vm4  ;;  %639 = vperm.xlu1 %1542, %v637_v48   ;;  %v1267_v51 = vsel %vm1266_vm9, 1, %v1852_v0 }
 0x134   :  { %1595 = vpow2.f32 %v1424_v58  ;;  %v394_v58 = vld [vmem:[#allocation4 + $0x18] sm:$0xff] }
 0x135   :  { %1597 = vtanh.f32 %v358_v59 }
 0x137   :  { %765 = vperm.xlu1 %1542, %v763_v49  }
 0x13b   :  { %1017 = vperm.xlu1 %1542, %v1015_v50  }
 0x13c   :  { %v1592_v60 = vpop.eup %1591 }
 0x13d   :  { %v1594_v61 = vpop.eup %1593  ;;  %v363_v62 = vadd.f32 1.0, %v1592_v60 }
 0x13e   :  { %v369_v63 = vadd.f32 1.0, %v1594_v61  ;;  %v1596_v27 = vpop.eup %1595 }
 0x13f   :  { %1599 = vrcp.f32 %v363_v62  ;;  %v1598_v31 = vpop.eup %1597  ;;  %v376_v38 = vadd.f32 1.0, %v1596_v27  ;;  %1269 = vperm.xlu1 %1542, %v1267_v51  }
 0x140   :  { %1601 = vrcp.f32 %v369_v63 }
 0x141   :  { %1603 = vrcp.f32 %v376_v38  ;;  %v398_v38 = vunpack.c.h.bf16 %v394_v58 }
 0x149   :  { %v1600_v35 = vpop.eup %1599 }
 0x14a   :  { %v1602_v39 = vpop.eup %1601  ;;  %v380_v40 = vmul.f32 %v1600_v35, %v1598_v31 }
 0x14b   :  { %v379_v41 = vmul.f32 0.0, %v1602_v39  ;;  %v1604_v43 = vpop.eup %1603 }
 0x14d   :  { %v2081_v42 = vadd.f32 %v380_v40, %v379_v41  ;;  %v397_v40 = vunpack.c.l.bf16 %v394_v58 }
 0x14f   :  { %1605 = vtanh.f32 %v2081_v42 }
 0x159   :  { %v1606_v45 = vpop.eup %1605 }
 0x15a   :  { %v2086_v46 = vmul.f32 %v1606_v45, %v1604_v43 }
 0x15c   :  { %v1448_v47 = vpack.c.bf16 %v2086_v46, %v2086_v46 }
 0x15e   :  { %1449 = vmatmul.mubr.msk.bf16.vlgmr.msra.gmra.mrb[4].mxu0 %vm1447_vm5, %v1448_v47  ;;  %1452 = vmatmul.mubr.msk.bf16.vlgmr.msra.gmra.mrb[4].mxu1 %vm1447_vm5, %v1448_v47 }
 0x15f   :  { %527 = vmatpush1.bf16.msra.mxu0 %v1936_v2  ;;  %568 = vmatpush1.bf16.msra.mxu1 %v1949_v7 }
 0x160   :  { %528 = vmatprep.subr.bf16.mxu0 %v1939_v3  ;;  %569 = vmatprep.subr.bf16.mxu1 %v1959_v10 }
 0x161   :  { %558 = vmatprep.mubr.bf16.mxu0 %v1852_v0  ;;  %599 = vmatprep.mubr.bf16.mxu1 %v1852_v0 }
 0x163   :  { %529 = vmatpush1.bf16.msra.mxu0 %v1942_v4  ;;  %570 = vmatpush1.bf16.msra.mxu1 %v1961_v11 }
 0x164   :  { %530 = vmatprep.subr.bf16.mxu0 %v1945_v5  ;;  %571 = vmatprep.subr.bf16.mxu1 %v1969_v14 }
 0x167   :  { %531 = vmatpush1.bf16.msra.mxu0 %v1952_v8  ;;  %572 = vmatpush1.bf16.msra.mxu1 %v1973_v15 }
 0x168   :  { %532 = vmatprep.subr.bf16.mxu0 %v1956_v9  ;;  %573 = vmatprep.subr.bf16.mxu1 %v1976_v16 }
 0x16b   :  { %533 = vmatpush1.bf16.msra.mxu0 %v1965_v12  ;;  %574 = vmatpush1.bf16.msra.mxu1 %v1985_v19 }
 0x16c   :  { %534 = vmatprep.subr.bf16.mxu0 %v1967_v13  ;;  %575 = vmatprep.subr.bf16.mxu1 %v1988_v20 }
 0x16f   :  { %535 = vmatpush1.bf16.msra.mxu0 %v1979_v17  ;;  %576 = vmatpush1.bf16.msra.mxu1 %v1997_v23 }
 0x170   :  { %536 = vmatprep.subr.bf16.mxu0 %v1982_v18  ;;  %577 = vmatprep.subr.bf16.mxu1 %v2000_v24 }
 0x173   :  { %537 = vmatpush1.bf16.msra.mxu0 %v1991_v21  ;;  %578 = vmatpush1.bf16.msra.mxu1 %v2017_v29 }
 0x174   :  { %538 = vmatprep.subr.bf16.mxu0 %v1993_v22  ;;  %579 = vmatprep.subr.bf16.mxu1 %v2020_v30 }
 0x177   :  { %539 = vmatpush1.bf16.msra.mxu0 %v2009_v26  ;;  %580 = vmatpush1.bf16.msra.mxu1 %v2029_v33 }
 0x178   :  { %540 = vmatprep.subr.bf16.mxu0 %v2014_v28  ;;  %581 = vmatprep.subr.bf16.mxu1 %v2032_v34 }
 0x17b   :  { %541 = vmatpush1.bf16.msra.mxu0 %v2024_v32  ;;  %582 = vmatpush1.bf16.msra.mxu1 %v2038_v36 }
 0x17c   :  { %652 = vmatprep.subr.bf16.mxu0 %v1934_v1  ;;  %693 = vmatprep.subr.bf16.mxu1 %v1947_v6 }
 0x231   :  { %v434_v55 = vpop.f32.mrb[4].mxu0  ;;  %v475_v56 = vpop.f32.mrb[4].mxu1 }
 0x232   :  { %v482_v57 = vadd.f32 %v434_v55, %v395_v53  ;;  %v436_v59 = vpop.f32.mrb[5].mxu0  ;;  %v477_v60 = vpop.f32.mrb[5].mxu1  ;;  %v484_v43 = vadd.f32 %v475_v56, %v397_v40  ;;  %v520_v40 = vld [vmem:[#allocation4 + $0x28] sm:$0xff] }
 0x233   :  { %v483_v61 = vadd.f32 %v436_v59, %v396_v54  ;;  %v438_v62 = vpop.f32.mrb[6].mxu0  ;;  %v479_v63 = vpop.f32.mrb[6].mxu1  ;;  %v485_v39 = vadd.f32 %v477_v60, %v398_v38  ;;  %v390_v54 = vsel %vm389_vm4, %v2081_v42, 0.0 }
 0x234   :  { %v1425_v27 = vmul.f32 -1.442695, %v482_v57  ;;  %v439_v31 = vpop.f32.mrb[7].mxu0  ;;  %v480_v35 = vpop.f32.mrb[7].mxu1 }
 0x235   :  { %v1426_v25 = vmul.f32 -1.442695, %v483_v61  ;;  %v1427_v41 = vmul.f32 -1.442695, %v485_v39  ;;  %v514_v56 = vpop.permute.xlu0 %513  ;;  %v522_v35 = vunpack.c.h.bf16 %v519_v44 }
 0x236   :  { %1607 = vpow2.f32 %v1425_v27  ;;  %vm515_vm10 = vcmp.eq.s32.totalorder %v514_v56, 1  ;;  %v391_v27 = vsel %vm389_vm4, %v2086_v46, 0.0  ;;  %v521_v46 = vunpack.c.l.bf16 %v519_v44  ;;  %v640_v44 = vpop.permute.xlu1 %639 }
 0x237   :  { %1609 = vpow2.f32 %v1426_v25  ;;  %vm641_vm11 = vcmp.eq.s32.totalorder %v640_v44, 1 }
 0x238   :  { %1611 = vpow2.f32 %v1427_v41 }
 0x239   :  { %1613 = vtanh.f32 %v484_v43 }
 0x240   :  { %v1608_v45 = vpop.eup %1607 }
 0x241   :  { %v1610_v47 = vpop.eup %1609  ;;  %v489_v48 = vadd.f32 1.0, %v1608_v45 }
 0x242   :  { %v495_v49 = vadd.f32 1.0, %v1610_v47  ;;  %v1612_v50 = vpop.eup %1611 }
 0x243   :  { %1615 = vrcp.f32 %v489_v48  ;;  %v1614_v51 = vpop.eup %1613  ;;  %v502_v57 = vadd.f32 1.0, %v1612_v50 }
 0x244   :  { %1617 = vrcp.f32 %v495_v49 }
 0x245   :  { %1619 = vrcp.f32 %v502_v57 }
 0x24d   :  { %v1616_v52 = vpop.eup %1615 }
 0x24e   :  { %v1618_v53 = vpop.eup %1617  ;;  %v506_v55 = vmul.f32 %v1616_v52, %v1614_v51 }
 0x24f   :  { %v505_v58 = vmul.f32 %v1618_v53, %v390_v54  ;;  %v1620_v61 = vpop.eup %1619  ;;  %v524_v53 = vunpack.c.h.bf16 %v520_v40 }
 0x251   :  { %v507_v59 = vadd.f32 %v506_v55, %v505_v58  ;;  %v523_v55 = vunpack.c.l.bf16 %v520_v40 }
 0x253   :  { %1621 = vtanh.f32 %v507_v59  ;;  %v2139_v60 = vsel %vm515_vm10, %v507_v59, %v390_v54 }
 0x25d   :  { %v1622_v62 = vpop.eup %1621 }
 0x25e   :  { %v509_v63 = vmul.f32 %v1622_v62, %v1620_v61 }
 0x260   :  { %v2144_v31 = vsel %vm515_vm10, %v509_v63, %v391_v27 }
 0x261   :  { %v525_v42 = vpack.c.bf16 %v2144_v31, %v2144_v31 }
 0x263   :  { %559 = vmatmul.mubr.bf16.vlgmr.msra.gmra.mrb[8].mxu0 %v525_v42  ;;  %600 = vmatmul.mubr.bf16.vlgmr.msra.gmra.mrb[8].mxu1 %v525_v42 }
 0x264   :  { %653 = vmatpush1.bf16.msra.mxu0 %v1936_v2  ;;  %694 = vmatpush1.bf16.msra.mxu1 %v1949_v7 }
 0x265   :  { %654 = vmatprep.subr.bf16.mxu0 %v1939_v3  ;;  %695 = vmatprep.subr.bf16.mxu1 %v1959_v10 }
 0x266   :  { %684 = vmatprep.mubr.bf16.mxu0 %v1852_v0  ;;  %725 = vmatprep.mubr.bf16.mxu1 %v1852_v0 }
 0x268   :  { %655 = vmatpush1.bf16.msra.mxu0 %v1942_v4  ;;  %696 = vmatpush1.bf16.msra.mxu1 %v1961_v11 }
 0x269   :  { %656 = vmatprep.subr.bf16.mxu0 %v1945_v5  ;;  %697 = vmatprep.subr.bf16.mxu1 %v1969_v14 }
 0x26c   :  { %657 = vmatpush1.bf16.msra.mxu0 %v1952_v8  ;;  %698 = vmatpush1.bf16.msra.mxu1 %v1973_v15 }
 0x26d   :  { %658 = vmatprep.subr.bf16.mxu0 %v1956_v9  ;;  %699 = vmatprep.subr.bf16.mxu1 %v1976_v16 }
 0x270   :  { %659 = vmatpush1.bf16.msra.mxu0 %v1965_v12  ;;  %700 = vmatpush1.bf16.msra.mxu1 %v1985_v19 }
 0x271   :  { %660 = vmatprep.subr.bf16.mxu0 %v1967_v13  ;;  %701 = vmatprep.subr.bf16.mxu1 %v1988_v20 }
 0x274   :  { %661 = vmatpush1.bf16.msra.mxu0 %v1979_v17  ;;  %702 = vmatpush1.bf16.msra.mxu1 %v1997_v23 }
 0x275   :  { %662 = vmatprep.subr.bf16.mxu0 %v1982_v18  ;;  %703 = vmatprep.subr.bf16.mxu1 %v2000_v24 }
 0x278   :  { %663 = vmatpush1.bf16.msra.mxu0 %v1991_v21  ;;  %704 = vmatpush1.bf16.msra.mxu1 %v2017_v29 }
 0x279   :  { %664 = vmatprep.subr.bf16.mxu0 %v1993_v22  ;;  %705 = vmatprep.subr.bf16.mxu1 %v2020_v30 }
 0x27c   :  { %665 = vmatpush1.bf16.msra.mxu0 %v2009_v26  ;;  %706 = vmatpush1.bf16.msra.mxu1 %v2029_v33 }
 0x27d   :  { %666 = vmatprep.subr.bf16.mxu0 %v2014_v28  ;;  %707 = vmatprep.subr.bf16.mxu1 %v2032_v34 }
 0x280   :  { %667 = vmatpush1.bf16.msra.mxu0 %v2024_v32  ;;  %708 = vmatpush1.bf16.msra.mxu1 %v2038_v36 }
 0x281   :  { %778 = vmatprep.subr.bf16.mxu0 %v1934_v1  ;;  %819 = vmatprep.subr.bf16.mxu1 %v1947_v6 }
 0x336   :  { %v560_v25 = vpop.f32.mrb[8].mxu0  ;;  %v601_v38 = vpop.f32.mrb[8].mxu1 }
 0x337   :  { %v608_v39 = vadd.f32 %v560_v25, %v521_v46  ;;  %v562_v41 = vpop.f32.mrb[9].mxu0  ;;  %v603_v43 = vpop.f32.mrb[9].mxu1  ;;  %v610_v58 = vadd.f32 %v601_v38, %v523_v55 }
 0x338   :  { %v609_v45 = vadd.f32 %v562_v41, %v522_v35  ;;  %v564_v47 = vpop.f32.mrb[10].mxu0  ;;  %v605_v48 = vpop.f32.mrb[10].mxu1  ;;  %v611_v54 = vadd.f32 %v603_v43, %v524_v53  ;;  %v646_v53 = vld [vmem:[#allocation4 + $0x38] sm:$0xff] }
 0x339   :  { %v1428_v49 = vmul.f32 -1.442695, %v608_v39  ;;  %v565_v50 = vpop.f32.mrb[11].mxu0  ;;  %v606_v51 = vpop.f32.mrb[11].mxu1  ;;  %v649_v44 = vunpack.c.l.bf16 %v646_v53 }
 0x33a   :  { %v1429_v52 = vmul.f32 -1.442695, %v609_v45  ;;  %v1430_v57 = vmul.f32 -1.442695, %v611_v54 }
 0x33b   :  { %1623 = vpow2.f32 %v1428_v49 }
 0x33c   :  { %1625 = vpow2.f32 %v1429_v52 }
 0x33d   :  { %1627 = vpow2.f32 %v1430_v57 }
 0x33e   :  { %1629 = vtanh.f32 %v610_v58 }
 0x345   :  { %v1624_v56 = vpop.eup %1623 }
 0x346   :  { %v1626_v59 = vpop.eup %1625  ;;  %v615_v61 = vadd.f32 1.0, %v1624_v56 }
 0x347   :  { %v621_v62 = vadd.f32 1.0, %v1626_v59  ;;  %v1628_v63 = vpop.eup %1627 }
 0x348   :  { %1631 = vrcp.f32 %v615_v61  ;;  %v1630_v27 = vpop.eup %1629  ;;  %v628_v35 = vadd.f32 1.0, %v1628_v63 }
 0x349   :  { %1633 = vrcp.f32 %v621_v62 }
 0x34a   :  { %1635 = vrcp.f32 %v628_v35 }
 0x352   :  { %v1632_v42 = vpop.eup %1631 }
 0x353   :  { %v1634_v46 = vpop.eup %1633  ;;  %v632_v25 = vmul.f32 %v1632_v42, %v1630_v27  ;;  %v650_v27 = vunpack.c.h.bf16 %v646_v53 }
 0x354   :  { %v631_v39 = vmul.f32 %v1634_v46, %v2139_v60  ;;  %v1636_v41 = vpop.eup %1635 }
 0x356   :  { %v633_v40 = vadd.f32 %v632_v25, %v631_v39 }
 0x358   :  { %1637 = vtanh.f32 %v633_v40  ;;  %v2184_v38 = vsel %vm641_vm11, %v633_v40, %v2139_v60  ;;  %v645_v60 = vld [vmem:[#allocation4 + $0x30] sm:$0xff] }
 0x359   :  { %v648_v49 = vunpack.c.h.bf16 %v645_v60 }
 0x362   :  { %v1638_v43 = vpop.eup %1637 }
 0x363   :  { %v635_v45 = vmul.f32 %v1638_v43, %v1636_v41 }
 0x365   :  { %v2187_v47 = vsel %vm641_vm11, %v635_v45, %v2144_v31  ;;  %v647_v31 = vunpack.c.l.bf16 %v645_v60 }
 0x366   :  { %v651_v48 = vpack.c.bf16 %v2187_v47, %v2187_v47 }
 0x368   :  { %685 = vmatmul.mubr.bf16.vlgmr.msra.gmra.mrb[12].mxu0 %v651_v48  ;;  %726 = vmatmul.mubr.bf16.vlgmr.msra.gmra.mrb[12].mxu1 %v651_v48 }
 0x369   :  { %779 = vmatpush1.bf16.msra.mxu0 %v1936_v2  ;;  %820 = vmatpush1.bf16.msra.mxu1 %v1949_v7 }
 0x36a   :  { %780 = vmatprep.subr.bf16.mxu0 %v1939_v3  ;;  %821 = vmatprep.subr.bf16.mxu1 %v1959_v10 }
 0x36b   :  { %810 = vmatprep.mubr.bf16.mxu0 %v1852_v0  ;;  %851 = vmatprep.mubr.bf16.mxu1 %v1852_v0 }
 0x36d   :  { %781 = vmatpush1.bf16.msra.mxu0 %v1942_v4  ;;  %822 = vmatpush1.bf16.msra.mxu1 %v1961_v11 }
 0x36e   :  { %782 = vmatprep.subr.bf16.mxu0 %v1945_v5  ;;  %823 = vmatprep.subr.bf16.mxu1 %v1969_v14 }
 0x371   :  { %783 = vmatpush1.bf16.msra.mxu0 %v1952_v8  ;;  %824 = vmatpush1.bf16.msra.mxu1 %v1973_v15 }
 0x372   :  { %784 = vmatprep.subr.bf16.mxu0 %v1956_v9  ;;  %825 = vmatprep.subr.bf16.mxu1 %v1976_v16 }
 0x375   :  { %785 = vmatpush1.bf16.msra.mxu0 %v1965_v12  ;;  %826 = vmatpush1.bf16.msra.mxu1 %v1985_v19 }
 0x376   :  { %786 = vmatprep.subr.bf16.mxu0 %v1967_v13  ;;  %827 = vmatprep.subr.bf16.mxu1 %v1988_v20 }
 0x379   :  { %787 = vmatpush1.bf16.msra.mxu0 %v1979_v17  ;;  %828 = vmatpush1.bf16.msra.mxu1 %v1997_v23 }
 0x37a   :  { %788 = vmatprep.subr.bf16.mxu0 %v1982_v18  ;;  %829 = vmatprep.subr.bf16.mxu1 %v2000_v24 }
 0x37d   :  { %789 = vmatpush1.bf16.msra.mxu0 %v1991_v21  ;;  %830 = vmatpush1.bf16.msra.mxu1 %v2017_v29 }
 0x37e   :  { %790 = vmatprep.subr.bf16.mxu0 %v1993_v22  ;;  %831 = vmatprep.subr.bf16.mxu1 %v2020_v30 }
 0x381   :  { %791 = vmatpush1.bf16.msra.mxu0 %v2009_v26  ;;  %832 = vmatpush1.bf16.msra.mxu1 %v2029_v33 }
 0x382   :  { %792 = vmatprep.subr.bf16.mxu0 %v2014_v28  ;;  %833 = vmatprep.subr.bf16.mxu1 %v2032_v34 }
 0x385   :  { %793 = vmatpush1.bf16.msra.mxu0 %v2024_v32  ;;  %834 = vmatpush1.bf16.msra.mxu1 %v2038_v36 }
 0x386   :  { %904 = vmatprep.subr.bf16.mxu0 %v1934_v1  ;;  %945 = vmatprep.subr.bf16.mxu1 %v1947_v6 }
 0x43b   :  { %v686_v50 = vpop.f32.mrb[12].mxu0  ;;  %v727_v51 = vpop.f32.mrb[12].mxu1 }
 0x43c   :  { %v734_v52 = vadd.f32 %v686_v50, %v647_v31  ;;  %v688_v54 = vpop.f32.mrb[13].mxu0  ;;  %v729_v55 = vpop.f32.mrb[13].mxu1  ;;  %v736_v35 = vadd.f32 %v727_v51, %v649_v44 }
 0x43d   :  { %v735_v57 = vadd.f32 %v688_v54, %v648_v49  ;;  %v690_v58 = vpop.f32.mrb[14].mxu0  ;;  %v731_v56 = vpop.f32.mrb[14].mxu1  ;;  %v737_v42 = vadd.f32 %v729_v55, %v650_v27 }
 0x43e   :  { %v1431_v59 = vmul.f32 -1.442695, %v734_v52  ;;  %v691_v61 = vpop.f32.mrb[15].mxu0  ;;  %v732_v62 = vpop.f32.mrb[15].mxu1 }
 0x43f   :  { %v1432_v63 = vmul.f32 -1.442695, %v735_v57  ;;  %v1433_v46 = vmul.f32 -1.442695, %v737_v42  ;;  %v766_v52 = vpop.permute.xlu1 %765 }
 0x440   :  { %1639 = vpow2.f32 %v1431_v59  ;;  %vm767_vm12 = vcmp.eq.s32.totalorder %v766_v52, 1  ;;  %v2277_v52 = vld [vmem:[#allocation7] ss:$16 sps:$4 sm:$0xff]  }
 0x441   :  { %1641 = vpow2.f32 %v1432_v63 }
 0x442   :  { %1643 = vpow2.f32 %v1433_v46 }
 0x443   :  { %1645 = vtanh.f32 %v736_v35 }
 0x44a   :  { %v1640_v25 = vpop.eup %1639 }
 0x44b   :  { %v1642_v39 = vpop.eup %1641  ;;  %v741_v40 = vadd.f32 1.0, %v1640_v25 }
 0x44c   :  { %v747_v41 = vadd.f32 1.0, %v1642_v39  ;;  %v1644_v43 = vpop.eup %1643 }
 0x44d   :  { %1647 = vrcp.f32 %v741_v40  ;;  %v1646_v45 = vpop.eup %1645  ;;  %v754_v49 = vadd.f32 1.0, %v1644_v43 }
 0x44e   :  { %1649 = vrcp.f32 %v747_v41  ;;  %v892_v41 = vpop.permute.xlu0 %891 }
 0x44f   :  { %1651 = vrcp.f32 %v754_v49  ;;  %vm893_vm13 = vcmp.eq.s32.totalorder %v892_v41, 1 }
 0x457   :  { %v1648_v48 = vpop.eup %1647 }
 0x458   :  { %v1650_v60 = vpop.eup %1649  ;;  %v758_v31 = vmul.f32 %v1648_v48, %v1646_v45 }
 0x459   :  { %v757_v50 = vmul.f32 %v1650_v60, %v2184_v38  ;;  %v1652_v54 = vpop.eup %1651 }
 0x45b   :  { %v759_v53 = vadd.f32 %v758_v31, %v757_v50 }
 0x45d   :  { %1653 = vtanh.f32 %v759_v53  ;;  %v2227_v51 = vsel %vm767_vm12, %v759_v53, %v2184_v38  ;;  %v2280_v53 = vld [vmem:[#allocation7 + $0x8] ss:$16 sps:$4 sm:$0xff]  }
 0x467   :  { %v1654_v55 = vpop.eup %1653 }
 0x468   :  { %v761_v57 = vmul.f32 %v1654_v55, %v1652_v54  ;;  %v2286_v54 = vld [vmem:[#allocation7 + $0x2c] ss:$16 sps:$4 sm:$0xff]   ;;  %v2291_v55 = vld [vmem:[#allocation7 + $0x20] ss:$16 sps:$4 sm:$0xff]  }
 0x46a   :  { %v2230_v58 = vsel %vm767_vm12, %v761_v57, %v2187_v47  ;;  %v2294_v57 = vld [vmem:[#allocation7 + $0x28] ss:$16 sps:$4 sm:$0xff]  }
 0x46b   :  { %v777_v56 = vpack.c.bf16 %v2230_v58, %v2230_v58 }
 0x46d   :  { %811 = vmatmul.mubr.bf16.vlgmr.msra.gmra.mrb[16].mxu0 %v777_v56  ;;  %852 = vmatmul.mubr.bf16.vlgmr.msra.gmra.mrb[16].mxu1 %v777_v56  ;;  %v2300_v56 = vld [vmem:[#allocation7 + $0x4c] ss:$16 sps:$4 sm:$0xff]  }
 0x46e   :  { %905 = vmatpush1.bf16.msra.mxu0 %v1936_v2  ;;  %946 = vmatpush1.bf16.msra.mxu1 %v1949_v7  ;;  %v771_v2 = vld [vmem:[#allocation4 + $0x40] sm:$0xff] }
 0x46f   :  { %906 = vmatprep.subr.bf16.mxu0 %v1939_v3  ;;  %947 = vmatprep.subr.bf16.mxu1 %v1959_v10  ;;  %v773_v3 = vunpack.c.l.bf16 %v771_v2 }
 0x470   :  { %936 = vmatprep.mubr.bf16.mxu0 %v1852_v0  ;;  %977 = vmatprep.mubr.bf16.mxu1 %v1852_v0 }
 0x472   :  { %907 = vmatpush1.bf16.msra.mxu0 %v1942_v4  ;;  %948 = vmatpush1.bf16.msra.mxu1 %v1961_v11  ;;  %v774_v4 = vunpack.c.h.bf16 %v771_v2  ;;  %v2303_v2 = vld [vmem:[#allocation7 + $0x40] ss:$16 sps:$4 sm:$0xff]  }
 0x473   :  { %908 = vmatprep.subr.bf16.mxu0 %v1945_v5  ;;  %949 = vmatprep.subr.bf16.mxu1 %v1969_v14 }
 0x476   :  { %909 = vmatpush1.bf16.msra.mxu0 %v1952_v8  ;;  %950 = vmatpush1.bf16.msra.mxu1 %v1973_v15 }
 0x477   :  { %910 = vmatprep.subr.bf16.mxu0 %v1956_v9  ;;  %951 = vmatprep.subr.bf16.mxu1 %v1976_v16  ;;  %v772_v9 = vld [vmem:[#allocation4 + $0x48] sm:$0xff] }
 0x478   :  { %v776_v38 = vunpack.c.h.bf16 %v772_v9 }
 0x47a   :  { %911 = vmatpush1.bf16.msra.mxu0 %v1965_v12  ;;  %952 = vmatpush1.bf16.msra.mxu1 %v1985_v19 }
 0x47b   :  { %912 = vmatprep.subr.bf16.mxu0 %v1967_v13  ;;  %953 = vmatprep.subr.bf16.mxu1 %v1988_v20 }
 0x47e   :  { %913 = vmatpush1.bf16.msra.mxu0 %v1979_v17  ;;  %954 = vmatpush1.bf16.msra.mxu1 %v1997_v23 }
 0x47f   :  { %914 = vmatprep.subr.bf16.mxu0 %v1982_v18  ;;  %955 = vmatprep.subr.bf16.mxu1 %v2000_v24 }
 0x482   :  { %915 = vmatpush1.bf16.msra.mxu0 %v1991_v21  ;;  %956 = vmatpush1.bf16.msra.mxu1 %v2017_v29 }
 0x483   :  { %916 = vmatprep.subr.bf16.mxu0 %v1993_v22  ;;  %957 = vmatprep.subr.bf16.mxu1 %v2020_v30 }
 0x486   :  { %917 = vmatpush1.bf16.msra.mxu0 %v2009_v26  ;;  %958 = vmatpush1.bf16.msra.mxu1 %v2029_v33 }
 0x487   :  { %918 = vmatprep.subr.bf16.mxu0 %v2014_v28  ;;  %959 = vmatprep.subr.bf16.mxu1 %v2032_v34 }
 0x48a   :  { %919 = vmatpush1.bf16.msra.mxu0 %v2024_v32  ;;  %960 = vmatpush1.bf16.msra.mxu1 %v2038_v36 }
 0x48b   :  { %1030 = vmatprep.subr.bf16.mxu0 %v1934_v1  ;;  %1071 = vmatprep.subr.bf16.mxu1 %v1947_v6  ;;  %v775_v6 = vunpack.c.l.bf16 %v772_v9  ;;  %v2323_v9 = vld [vmem:[#allocation7 + $0x80] ss:$16 sps:$4 sm:$0xff]  }
 0x540   :  { %v812_v5 = vpop.f32.mrb[16].mxu0  ;;  %v853_v7 = vpop.f32.mrb[16].mxu1 }
 0x541   :  { %v860_v8 = vadd.f32 %v812_v5, %v773_v3  ;;  %v814_v10 = vpop.f32.mrb[17].mxu0  ;;  %v855_v11 = vpop.f32.mrb[17].mxu1  ;;  %v862_v59 = vadd.f32 %v853_v7, %v775_v6  ;;  %v2306_v3 = vld [vmem:[#allocation7 + $0x48] ss:$16 sps:$4 sm:$0xff]   ;;  %v2312_v5 = vld [vmem:[#allocation7 + $0x6c] ss:$16 sps:$4 sm:$0xff]  }
 0x542   :  { %v861_v12 = vadd.f32 %v814_v10, %v774_v4  ;;  %v816_v13 = vpop.f32.mrb[18].mxu0  ;;  %v857_v14 = vpop.f32.mrb[18].mxu1  ;;  %v863_v1 = vadd.f32 %v855_v11, %v776_v38  ;;  %v2309_v4 = vld [vmem:[#allocation7 + $0x64] ss:$16 sps:$4 sm:$0xff]   ;;  %v2315_v7 = vld [vmem:[#allocation7 + $0x60] ss:$16 sps:$4 sm:$0xff]  }
 0x543   :  { %v1434_v15 = vmul.f32 -1.442695, %v860_v8  ;;  %v817_v16 = vpop.f32.mrb[19].mxu0  ;;  %v858_v17 = vpop.f32.mrb[19].mxu1  ;;  %v2319_v8 = vld [vmem:[#allocation7 + $0x84] ss:$16 sps:$4 sm:$0xff]  }
 0x544   :  { %v1435_v18 = vmul.f32 -1.442695, %v861_v12  ;;  %v1436_v47 = vmul.f32 -1.442695, %v863_v1  ;;  %v2327_v10 = vld [vmem:[#allocation7 + $0xa4] ss:$16 sps:$4 sm:$0xff]  }
 0x545   :  { %1655 = vpow2.f32 %v1434_v15 }
 0x546   :  { %1657 = vpow2.f32 %v1435_v18 }
 0x547   :  { %1659 = vpow2.f32 %v1436_v47 }
 0x548   :  { %1661 = vtanh.f32 %v862_v59 }
 0x54f   :  { %v1656_v61 = vpop.eup %1655 }
 0x550   :  { %v1658_v62 = vpop.eup %1657  ;;  %v867_v63 = vadd.f32 1.0, %v1656_v61 }
 0x551   :  { %v873_v27 = vadd.f32 1.0, %v1658_v62  ;;  %v1660_v42 = vpop.eup %1659 }
 0x552   :  { %1663 = vrcp.f32 %v867_v63  ;;  %v1662_v44 = vpop.eup %1661  ;;  %v880_v39 = vadd.f32 1.0, %v1660_v42 }
 0x553   :  { %1665 = vrcp.f32 %v873_v27 }
 0x554   :  { %1667 = vrcp.f32 %v880_v39 }
 0x55c   :  { %v1664_v46 = vpop.eup %1663 }
 0x55d   :  { %v1666_v35 = vpop.eup %1665  ;;  %v884_v25 = vmul.f32 %v1664_v46, %v1662_v44 }
 0x55e   :  { %v883_v40 = vmul.f32 %v1666_v35, %v2227_v51  ;;  %v1668_v48 = vpop.eup %1667  ;;  %v1018_v35 = vpop.permute.xlu1 %1017 }
 0x55f   :  { %vm1019_vm14 = vcmp.eq.s32.totalorder %v1018_v35, 1  ;;  %v1281_v35 = vld [vmem:[#allocation9 + $0x8] sm:$0xff] }
 0x560   :  { %v885_v43 = vadd.f32 %v884_v25, %v883_v40 }
 0x562   :  { %1669 = vtanh.f32 %v885_v43  ;;  %v2270_v45 = vsel %vm893_vm13, %v885_v43, %v2227_v51  ;;  %v2283_v51 = vld [vmem:[#allocation7 + $0x24] ss:$16 sps:$4 sm:$0xff]  }
 0x56c   :  { %v1670_v60 = vpop.eup %1669 }
 0x56d   :  { %v887_v31 = vmul.f32 %v1670_v60, %v1668_v48 }
 0x56f   :  { %v2273_v49 = vsel %vm893_vm13, %v887_v31, %v2230_v58  ;;  %v2297_v58 = vld [vmem:[#allocation7 + $0x44] ss:$16 sps:$4 sm:$0xff]   ;;  %v1739_v31 = vld [vmem:[#allocation7 + $0x88] ss:$16 sps:$4 sm:$0xff]  }
 0x570   :  { %v903_v50 = vpack.c.bf16 %v2273_v49, %v2273_v49 }
 0x572   :  { %937 = vmatmul.mubr.bf16.vlgmr.msra.gmra.mrb[20].mxu0 %v903_v50  ;;  %978 = vmatmul.mubr.bf16.vlgmr.msra.gmra.mrb[20].mxu1 %v903_v50  ;;  %v1741_v50 = vld [vmem:[#allocation7 + $0xa0] ss:$16 sps:$4 sm:$0xff]  }
 0x573   :  { %1031 = vmatpush1.bf16.msra.mxu0 %v2277_v52  ;;  %1072 = vmatpush1.bf16.msra.mxu1 %v2280_v53 }
 0x574   :  { %1032 = vmatprep.subr.bf16.mxu0 %v2283_v51  ;;  %1073 = vmatprep.subr.bf16.mxu1 %v2286_v54 }
 0x575   :  { %1062 = vmatprep.mubr.bf16.mxu0 %v1852_v0  ;;  %1103 = vmatprep.mubr.bf16.mxu1 %v1852_v0 }
 0x577   :  { %1033 = vmatpush1.bf16.msra.mxu0 %v2291_v55  ;;  %1074 = vmatpush1.bf16.msra.mxu1 %v2294_v57 }
 0x578   :  { %1034 = vmatprep.subr.bf16.mxu0 %v2297_v58  ;;  %1075 = vmatprep.subr.bf16.mxu1 %v2300_v56 }
 0x57b   :  { %1035 = vmatpush1.bf16.msra.mxu0 %v2303_v2  ;;  %1076 = vmatpush1.bf16.msra.mxu1 %v2306_v3 }
 0x57c   :  { %1036 = vmatprep.subr.bf16.mxu0 %v2309_v4  ;;  %1077 = vmatprep.subr.bf16.mxu1 %v2312_v5 }
 0x57f   :  { %1037 = vmatpush1.bf16.msra.mxu0 %v2315_v7  ;;  %1078 = vmatpush1.bf16.msra.mxu1 %v1985_v19  ;;  %v1735_v19 = vld [vmem:[#allocation7 + $0x4] ss:$16 sps:$4 sm:$0xff]  }
 0x580   :  { %1038 = vmatprep.subr.bf16.mxu0 %v2319_v8  ;;  %1079 = vmatprep.subr.bf16.mxu1 %v1988_v20  ;;  %v1736_v20 = vld [vmem:[#allocation7 + $0xc] ss:$16 sps:$4 sm:$0xff]  }
 0x583   :  { %1039 = vmatpush1.bf16.msra.mxu0 %v2323_v9  ;;  %1080 = vmatpush1.bf16.msra.mxu1 %v1997_v23 }
 0x584   :  { %1040 = vmatprep.subr.bf16.mxu0 %v2327_v10  ;;  %1081 = vmatprep.subr.bf16.mxu1 %v2000_v24 }
 0x587   :  { %1041 = vmatpush1.bf16.msra.mxu0 %v1991_v21  ;;  %1082 = vmatpush1.bf16.msra.mxu1 %v2017_v29  ;;  %v897_v21 = vld [vmem:[#allocation4 + $0x50] sm:$0xff] }
 0x588   :  { %1042 = vmatprep.subr.bf16.mxu0 %v1993_v22  ;;  %1083 = vmatprep.subr.bf16.mxu1 %v2020_v30  ;;  %v899_v22 = vunpack.c.l.bf16 %v897_v21  ;;  %v900_v23 = vunpack.c.h.bf16 %v897_v21  ;;  %v898_v30 = vld [vmem:[#allocation4 + $0x58] sm:$0xff] }
 0x589   :  { %v902_v15 = vunpack.c.h.bf16 %v898_v30  ;;  %v901_v17 = vunpack.c.l.bf16 %v898_v30 }
 0x58b   :  { %1043 = vmatpush1.bf16.msra.mxu0 %v2009_v26  ;;  %1084 = vmatpush1.bf16.msra.mxu1 %v2029_v33 }
 0x58c   :  { %1044 = vmatprep.subr.bf16.mxu0 %v2014_v28  ;;  %1085 = vmatprep.subr.bf16.mxu1 %v2032_v34 }
 0x58f   :  { %1045 = vmatpush1.bf16.msra.mxu0 %v2024_v32  ;;  %1086 = vmatpush1.bf16.msra.mxu1 %v2038_v36 }
 0x590   :  { %1156 = vmatprep.subr.bf16.mxu0 %v1735_v19  ;;  %1197 = vmatprep.subr.bf16.mxu1 %v1736_v20 }
 0x645   :  { %v938_v24 = vpop.f32.mrb[20].mxu0  ;;  %v979_v29 = vpop.f32.mrb[20].mxu1 }
 0x646   :  { %v986_v26 = vadd.f32 %v938_v24, %v899_v22  ;;  %v940_v33 = vpop.f32.mrb[21].mxu0  ;;  %v981_v11 = vpop.f32.mrb[21].mxu1  ;;  %v988_v38 = vadd.f32 %v979_v29, %v901_v17 }
 0x647   :  { %v987_v28 = vadd.f32 %v940_v33, %v900_v23  ;;  %v942_v12 = vpop.f32.mrb[22].mxu0  ;;  %v983_v34 = vpop.f32.mrb[22].mxu1  ;;  %v989_v16 = vadd.f32 %v981_v11, %v902_v15 }
 0x648   :  { %v1437_v13 = vmul.f32 -1.442695, %v986_v26  ;;  %v943_v32 = vpop.f32.mrb[23].mxu0  ;;  %v984_v14 = vpop.f32.mrb[23].mxu1 }
 0x649   :  { %v1438_v36 = vmul.f32 -1.442695, %v987_v28  ;;  %v1439_v18 = vmul.f32 -1.442695, %v989_v16 }
 0x64a   :  { %1671 = vpow2.f32 %v1437_v13 }
 0x64b   :  { %1673 = vpow2.f32 %v1438_v36 }
 0x64c   :  { %1675 = vpow2.f32 %v1439_v18 }
 0x64d   :  { %1677 = vtanh.f32 %v988_v38 }
 0x654   :  { %v1672_v1 = vpop.eup %1671 }
 0x655   :  { %v1674_v6 = vpop.eup %1673  ;;  %v993_v47 = vadd.f32 1.0, %v1672_v1 }
 0x656   :  { %v999_v59 = vadd.f32 1.0, %v1674_v6  ;;  %v1676_v61 = vpop.eup %1675  ;;  %v1144_v6 = vpop.permute.xlu0 %1143 }
 0x657   :  { %1679 = vrcp.f32 %v993_v47  ;;  %v1678_v62 = vpop.eup %1677  ;;  %v1006_v44 = vadd.f32 1.0, %v1676_v61  ;;  %vm1145_vm15 = vcmp.eq.s32.totalorder %v1144_v6, 1 }
 0x658   :  { %1681 = vrcp.f32 %v999_v59 }
 0x659   :  { %1683 = vrcp.f32 %v1006_v44 }
 0x661   :  { %v1680_v63 = vpop.eup %1679 }
 0x662   :  { %v1682_v27 = vpop.eup %1681  ;;  %v1010_v42 = vmul.f32 %v1680_v63, %v1678_v62 }
 0x663   :  { %v1009_v46 = vmul.f32 %v1682_v27, %v2270_v45  ;;  %v1684_v40 = vpop.eup %1683 }
 0x665   :  { %v1011_v25 = vadd.f32 %v1010_v42, %v1009_v46  ;;  %v1280_v46 = vld [vmem:[#allocation9] sm:$0xff] }
 0x667   :  { %1685 = vtanh.f32 %v1011_v25  ;;  %v2343_v39 = vsel %vm1019_vm14, %v1011_v25, %v2270_v45  ;;  %v1737_v45 = vld [vmem:[#allocation7 + $0x68] ss:$16 sps:$4 sm:$0xff]   ;;  %v1506_v25 = vpack.c.bf16 %v1281_v35, %v1280_v46  ;;  %v1446_v35 = vld [vmem:[%s2406_s4] ss:$0 sm:$0xff] }
 0x671   :  { %v1686_v41 = vpop.eup %1685 }
 0x672   :  { %v1013_v43 = vmul.f32 %v1686_v41, %v1684_v40  ;;  %v1282_v40 = vld [vmem:[#allocation9 + $0x10] sm:$0xff] }
 0x674   :  { %v2346_v48 = vsel %vm1019_vm14, %v1013_v43, %v2273_v49  ;;  %v1740_v49 = vld [vmem:[#allocation7 + $0xac] ss:$16 sps:$4 sm:$0xff]   ;;  %v1284_v43 = vld [vmem:[#allocation9 + $0x20] sm:$0xff] }
 0x675   :  { %v1029_v60 = vpack.c.bf16 %v2346_v48, %v2346_v48 }
 0x677   :  { %1063 = vmatmul.mubr.bf16.vlgmr.msra.gmra.mrb[24].mxu0 %v1029_v60  ;;  %1104 = vmatmul.mubr.bf16.vlgmr.msra.gmra.mrb[24].mxu1 %v1029_v60 }
 0x678   :  { %1157 = vmatpush1.bf16.msra.mxu0 %v2277_v52  ;;  %1198 = vmatpush1.bf16.msra.mxu1 %v2280_v53  ;;  %v1742_v52 = vld [vmem:[#allocation7 + $0xa8] ss:$16 sps:$4 sm:$0xff]   ;;  %v1743_v53 = vld [vmem:[#allocation7 + $0xc4] ss:$16 sps:$4 sm:$0xff]  }
 0x679   :  { %1158 = vmatprep.subr.bf16.mxu0 %v2283_v51  ;;  %1199 = vmatprep.subr.bf16.mxu1 %v2286_v54  ;;  %v1744_v51 = vld [vmem:[#allocation7 + $0xcc] ss:$16 sps:$4 sm:$0xff]   ;;  %v1745_v54 = vld [vmem:[#allocation7 + $0xc0] ss:$16 sps:$4 sm:$0xff]  }
 0x67a   :  { %1188 = vmatprep.mubr.bf16.mxu0 %v1852_v0  ;;  %1229 = vmatprep.mubr.bf16.mxu1 %v1852_v0  ;;  %v1738_v0 = vld [vmem:[#allocation7 + $0x8c] ss:$16 sps:$4 sm:$0xff]  }
 0x67c   :  { %1159 = vmatpush1.bf16.msra.mxu0 %v2291_v55  ;;  %1200 = vmatpush1.bf16.msra.mxu1 %v2294_v57  ;;  %v1746_v55 = vld [vmem:[#allocation7 + $0xc8] ss:$16 sps:$4 sm:$0xff]   ;;  %v1747_v57 = vld [vmem:[#allocation7 + $0xe4] ss:$16 sps:$4 sm:$0xff]  }
 0x67d   :  { %1160 = vmatprep.subr.bf16.mxu0 %v2297_v58  ;;  %1201 = vmatprep.subr.bf16.mxu1 %v2300_v56  ;;  %v1748_v58 = vld [vmem:[#allocation7 + $0xec] ss:$16 sps:$4 sm:$0xff]   ;;  %v1749_v56 = vld [vmem:[#allocation7 + $0xe0] ss:$16 sps:$4 sm:$0xff]  }
 0x680   :  { %1161 = vmatpush1.bf16.msra.mxu0 %v2303_v2  ;;  %1202 = vmatpush1.bf16.msra.mxu1 %v2306_v3  ;;  %v1750_v2 = vld [vmem:[#allocation7 + $0xe8] ss:$16 sps:$4 sm:$0xff]   ;;  %v1023_v3 = vld [vmem:[#allocation4 + $0x60] sm:$0xff] }
 0x681   :  { %1162 = vmatprep.subr.bf16.mxu0 %v2309_v4  ;;  %1203 = vmatprep.subr.bf16.mxu1 %v2312_v5  ;;  %v1025_v4 = vunpack.c.l.bf16 %v1023_v3  ;;  %v1026_v5 = vunpack.c.h.bf16 %v1023_v3  ;;  %v1295_v3 = vld [vmem:[#allocation9 + $0x78] sm:$0xff] }
 0x684   :  { %1163 = vmatpush1.bf16.msra.mxu0 %v2315_v7  ;;  %1204 = vmatpush1.bf16.msra.mxu1 %v1737_v45  ;;  %v1286_v45 = vld [vmem:[#allocation9 + $0x30] sm:$0xff] }
 0x685   :  { %1164 = vmatprep.subr.bf16.mxu0 %v2319_v8  ;;  %1205 = vmatprep.subr.bf16.mxu1 %v1738_v0  ;;  %v1287_v0 = vld [vmem:[#allocation9 + $0x38] sm:$0xff] }
 0x688   :  { %1165 = vmatpush1.bf16.msra.mxu0 %v2323_v9  ;;  %1206 = vmatpush1.bf16.msra.mxu1 %v1739_v31  ;;  %v1515_v31 = vpack.c.bf16 %v1287_v0, %v1286_v45 }
 0x689   :  { %1166 = vmatprep.subr.bf16.mxu0 %v2327_v10  ;;  %1207 = vmatprep.subr.bf16.mxu1 %v1740_v49  ;;  %v1024_v10 = vld [vmem:[#allocation4 + $0x68] sm:$0xff]  ;;  %v1288_v49 = vld [vmem:[#allocation9 + $0x40] sm:$0xff] }
 0x68a   :  { %v1028_v33 = vunpack.c.h.bf16 %v1024_v10  ;;  %v1027_v28 = vunpack.c.l.bf16 %v1024_v10 }
 0x68c   :  { %1167 = vmatpush1.bf16.msra.mxu0 %v1741_v50  ;;  %1208 = vmatpush1.bf16.msra.mxu1 %v1742_v52  ;;  %v1289_v50 = vld [vmem:[#allocation9 + $0x48] sm:$0xff] }
 0x68d   :  { %1168 = vmatprep.subr.bf16.mxu0 %v1743_v53  ;;  %1209 = vmatprep.subr.bf16.mxu1 %v1744_v51  ;;  %v1518_v52 = vpack.c.bf16 %v1289_v50, %v1288_v49  ;;  %v1290_v53 = vld [vmem:[#allocation9 + $0x50] sm:$0xff]  ;;  %v1291_v51 = vld [vmem:[#allocation9 + $0x58] sm:$0xff] }
 0x690   :  { %1169 = vmatpush1.bf16.msra.mxu0 %v1745_v54  ;;  %1210 = vmatpush1.bf16.msra.mxu1 %v1746_v55  ;;  %v1521_v54 = vpack.c.bf16 %v1291_v51, %v1290_v53  ;;  %v1292_v55 = vld [vmem:[#allocation9 + $0x60] sm:$0xff] }
 0x691   :  { %1170 = vmatprep.subr.bf16.mxu0 %v1747_v57  ;;  %1211 = vmatprep.subr.bf16.mxu1 %v1748_v58  ;;  %v1293_v57 = vld [vmem:[#allocation9 + $0x68] sm:$0xff]  ;;  %v1855_v58 = vmov 0.0  }
 0x694   :  { %1171 = vmatpush1.bf16.msra.mxu0 %v1749_v56  ;;  %1212 = vmatpush1.bf16.msra.mxu1 %v1750_v2  ;;  %v1524_v56 = vpack.c.bf16 %v1293_v57, %v1292_v55  ;;  %v1294_v2 = vld [vmem:[#allocation9 + $0x70] sm:$0xff] }
 0x695   :  { %1505 = vmatprep.subr.bf16.mxu0 %v1853_v37 }
 0x74a   :  { %v1064_v7 = vpop.f32.mrb[24].mxu0  ;;  %v1105_v8 = vpop.f32.mrb[24].mxu1 }
 0x74b   :  { %v1112_v9 = vadd.f32 %v1064_v7, %v1025_v4  ;;  %v1066_v19 = vpop.f32.mrb[25].mxu0  ;;  %v1107_v20 = vpop.f32.mrb[25].mxu1  ;;  %v1114_v34 = vadd.f32 %v1105_v8, %v1027_v28  ;;  %v1527_v4 = vpack.c.bf16 %v1295_v3, %v1294_v2 }
 0x74c   :  { %v1113_v21 = vadd.f32 %v1066_v19, %v1026_v5  ;;  %v1068_v22 = vpop.f32.mrb[26].mxu0  ;;  %v1109_v23 = vpop.f32.mrb[26].mxu1  ;;  %v1115_v11 = vadd.f32 %v1107_v20, %v1028_v33  ;;  %v1149_v5 = vld [vmem:[#allocation4 + $0x70] sm:$0xff]  ;;  %v1150_v20 = vld [vmem:[#allocation4 + $0x78] sm:$0xff] }
 0x74d   :  { %v1440_v24 = vmul.f32 -1.442695, %v1112_v9  ;;  %v1069_v29 = vpop.f32.mrb[27].mxu0  ;;  %v1110_v26 = vpop.f32.mrb[27].mxu1  ;;  %v1151_v7 = vunpack.c.l.bf16 %v1149_v5  ;;  %v1152_v8 = vunpack.c.h.bf16 %v1149_v5  ;;  %v1154_v28 = vunpack.c.h.bf16 %v1150_v20 }
 0x74e   :  { %v1441_v30 = vmul.f32 -1.442695, %v1113_v21  ;;  %v1442_v12 = vmul.f32 -1.442695, %v1115_v11 }
 0x74f   :  { %1687 = vpow2.f32 %v1440_v24 }
 0x750   :  { %1689 = vpow2.f32 %v1441_v30 }
 0x751   :  { %1691 = vpow2.f32 %v1442_v12  ;;  %v1153_v12 = vunpack.c.l.bf16 %v1150_v20 }
 0x752   :  { %1693 = vtanh.f32 %v1114_v34 }
 0x759   :  { %v1688_v13 = vpop.eup %1687 }
 0x75a   :  { %v1690_v32 = vpop.eup %1689  ;;  %v1119_v14 = vadd.f32 1.0, %v1688_v13 }
 0x75b   :  { %v1125_v36 = vadd.f32 1.0, %v1690_v32  ;;  %v1692_v15 = vpop.eup %1691 }
 0x75c   :  { %1695 = vrcp.f32 %v1119_v14  ;;  %v1694_v16 = vpop.eup %1693  ;;  %v1132_v1 = vadd.f32 1.0, %v1692_v15 }
 0x75d   :  { %1697 = vrcp.f32 %v1125_v36 }
 0x75e   :  { %1699 = vrcp.f32 %v1132_v1 }
 0x766   :  { %v1696_v17 = vpop.eup %1695 }
 0x767   :  { %v1698_v18 = vpop.eup %1697  ;;  %v1136_v38 = vmul.f32 %v1696_v17, %v1694_v16 }
 0x768   :  { %v1135_v47 = vmul.f32 %v1698_v18, %v2343_v39  ;;  %v1700_v62 = vpop.eup %1699 }
 0x76a   :  { %v1137_v59 = vadd.f32 %v1136_v38, %v1135_v47 }
 0x76c   :  { %1701 = vtanh.f32 %v1137_v59  ;;  %v2371_v61 = vsel %vm1145_vm15, %v1137_v59, %v2343_v39  ;;  %v1283_v39 = vld [vmem:[#allocation9 + $0x18] sm:$0xff] }
 0x76d   :  { %v1509_v41 = vpack.c.bf16 %v1283_v39, %v1282_v40 }
 0x776   :  { %v1702_v63 = vpop.eup %1701 }
 0x777   :  { %v1139_v27 = vmul.f32 %v1702_v63, %v1700_v62  ;;  %v1270_v63 = vpop.permute.xlu1 %1269 }
 0x778   :  { %vm1271_vm1 = vcmp.eq.s32.totalorder %v1270_v63, 1 }
 0x779   :  { %v2374_v42 = vsel %vm1145_vm15, %v1139_v27, %v2346_v48  ;;  %v1285_v48 = vld [vmem:[#allocation9 + $0x28] sm:$0xff] }
 0x77a   :  { %v1155_v44 = vpack.c.bf16 %v2374_v42, %v2374_v42  ;;  %v1512_v60 = vpack.c.bf16 %v1285_v48, %v1284_v43 }
 0x77c   :  { %1189 = vmatmul.mubr.bf16.vlgmr.msra.gmra.mrb[28].mxu0 %v1155_v44  ;;  %1230 = vmatmul.mubr.bf16.vlgmr.msra.gmra.mrb[28].mxu1 %v1155_v44 }
 0x77d   :  { %1507 = vmatpush3.bf16.msra.mxu0 %v1506_v25  ;;  %1502 = vmatprep.mubr.msk.f32.mxu0 %vm1854_vm0, %v1855_v58 }
 0x77e   :  { %1508 = vmatprep.subr.bf16.mxu0 %v1853_v37 }
 0x781   :  { %1510 = vmatpush3.bf16.msra.mxu0 %v1509_v41 }
 0x782   :  { %1511 = vmatprep.subr.bf16.mxu0 %v1853_v37 }
 0x785   :  { %1513 = vmatpush3.bf16.msra.mxu0 %v1512_v60 }
 0x786   :  { %1514 = vmatprep.subr.bf16.mxu0 %v1853_v37 }
 0x789   :  { %1516 = vmatpush3.bf16.msra.mxu0 %v1515_v31 }
 0x78a   :  { %1517 = vmatprep.subr.bf16.mxu0 %v1853_v37 }
 0x78d   :  { %1519 = vmatpush3.bf16.msra.mxu0 %v1518_v52 }
 0x78e   :  { %1520 = vmatprep.subr.bf16.mxu0 %v1853_v37 }
 0x791   :  { %1522 = vmatpush3.bf16.msra.mxu0 %v1521_v54 }
 0x792   :  { %1523 = vmatprep.subr.bf16.mxu0 %v1853_v37 }
 0x795   :  { %1525 = vmatpush3.bf16.msra.mxu0 %v1524_v56 }
 0x796   :  { %1526 = vmatprep.subr.bf16.mxu0 %v1853_v37 }
 0x799   :  { %1528 = vmatpush3.bf16.msra.mxu0 %v1527_v4 }
 0x84f   :  { %v1190_v9 = vpop.f32.mrb[28].mxu0  ;;  %v1231_v10 = vpop.f32.mrb[28].mxu1 }
 0x850   :  { %v1238_v19 = vadd.f32 %v1190_v9, %v1151_v7  ;;  %v1192_v21 = vpop.f32.mrb[29].mxu0  ;;  %v1233_v22 = vpop.f32.mrb[29].mxu1  ;;  %v1240_v13 = vadd.f32 %v1231_v10, %v1153_v12 }
 0x851   :  { %v1239_v23 = vadd.f32 %v1192_v21, %v1152_v8  ;;  %v1194_v24 = vpop.f32.mrb[30].mxu0  ;;  %v1235_v29 = vpop.f32.mrb[30].mxu1  ;;  %v1241_v37 = vadd.f32 %v1233_v22, %v1154_v28 }
 0x852   :  { %v1443_v26 = vmul.f32 -1.442695, %v1238_v19  ;;  %v1195_v30 = vpop.f32.mrb[31].mxu0  ;;  %v1236_v33 = vpop.f32.mrb[31].mxu1 }
 0x853   :  { %v1444_v11 = vmul.f32 -1.442695, %v1239_v23  ;;  %v1445_v34 = vmul.f32 -1.442695, %v1241_v37 }
 0x854   :  { %1703 = vpow2.f32 %v1443_v26 }
 0x855   :  { %1705 = vpow2.f32 %v1444_v11 }
 0x856   :  { %1707 = vpow2.f32 %v1445_v34 }
 0x857   :  { %1709 = vtanh.f32 %v1240_v13 }
 0x85e   :  { %v1704_v32 = vpop.eup %1703 }
 0x85f   :  { %v1706_v14 = vpop.eup %1705  ;;  %v1245_v36 = vadd.f32 1.0, %v1704_v32 }
 0x860   :  { %v1251_v15 = vadd.f32 1.0, %v1706_v14  ;;  %v1708_v16 = vpop.eup %1707 }
 0x861   :  { %1711 = vrcp.f32 %v1245_v36  ;;  %v1710_v17 = vpop.eup %1709  ;;  %v1258_v6 = vadd.f32 1.0, %v1708_v16 }
 0x862   :  { %1713 = vrcp.f32 %v1251_v15 }
 0x863   :  { %1715 = vrcp.f32 %v1258_v6 }
 0x86b   :  { %v1712_v18 = vpop.eup %1711 }
 0x86c   :  { %v1714_v38 = vpop.eup %1713  ;;  %v1262_v1 = vmul.f32 %v1712_v18, %v1710_v17 }
 0x86d   :  { %v1261_v47 = vmul.f32 %v1714_v38, %v2371_v61  ;;  %v1716_v62 = vpop.eup %1715 }
 0x86f   :  { %v1263_v59 = vadd.f32 %v1262_v1, %v1261_v47 }
 0x871   :  { %1717 = vtanh.f32 %v1263_v59 }
 0x87b   :  { %v1718_v27 = vpop.eup %1717 }
 0x87c   :  { %v1265_v44 = vmul.f32 %v1718_v27, %v1716_v62 }
 0x87e   :  { %v1273_v46 = vsel %vm1271_vm1, %v1265_v44, %v2374_v42 }
 0x87f   :  { %1503 = vmatmul.mubr.f32.vlgmr.msra.gmra.mrb[32].mxu0 %v1273_v46 }
 0x952   :  { %v1369_v25 = vpop.f32.mrb[32].mxu0 }
 0x953   :  { %v1370_v40 = vadd.f32 %v1446_v35, %v1369_v25  ;;  %v1504_v61 = vpop.f32.mrb[33].mxu0 }
 0x955   :  { %1373 = vst [vmem:[#allocation10] sm:$0xff] %v1370_v40 }
 0x956   :  { %1828 = shalt.err (!%p1825_p0)
}
 0x957   :  { %s1829_s13 = scalar_lea.hbm %s2407_s5, 128 }
 0x958   :  { %p1830_p1 = scmp.ne.s32.totalorder %s2407_s5, %s1829_s13  ;;  %p1833_p2 = scmp.lt.u32.totalorder %s1829_s13, %s2407_s5 }
 0x95a   :  { %p1835_p3 = pnand %p1833_p2, %p1830_p1 }
 0x95c   :  { %1838 = shalt.err (!%p1835_p3)
}
 0x95d   :  { %1383 = dma.vmem_to_hbm [thread:$0]  %s1381_s9, 128, %s2407_s5, [#allocation6]  }
 0x95e   :  { %1843 = dma.done.wait [#allocation6], 128  }
 0x95f   :  { %1844 = vsyncadd [#allocation6], 4294967168 }
 0x960   :  { %1387 = vsyncpa [#allocation5], 1 }
 0x961   :  { %1388 = vsyncpa [#allocation8], 1 }
 0x962   :  { %1389 = vsyncpa [#allocation6], 1 }

</bundles_post_ra>
